<compile_context>
chip_gen: v5e
topology: v5e:2x2
jax: 0.10.0
libtpu: 0.0.40
codegen_flags: <defaults>
</compile_context>

<pallas_src>
import functools

import jax
import jax.numpy as jnp
from jax.experimental import pallas as pl
from jax.experimental.pallas import tpu as pltpu


def _lstm_kernel(xg_ref, mask_ref, wh_ref, h0_ref, c0_ref,
                 hts_ref, cts_ref, h_sc, c_sc):
    # Grid: (batch_tile b, time_block t); time is the inner, sequential axis.
    t = pl.program_id(1)

    @pl.when(t == 0)
    def _():
        h_sc[...] = h0_ref[...]
        c_sc[...] = c0_ref[...]

    TT = xg_ref.shape[0]          # timesteps per grid step (static)
    Hp = h_sc.shape[-1]           # lane-aligned hidden size (static)

    wh = wh_ref[...]              # (Hp, 4Hp) bf16, grid-invariant (resident)

    def step(tt, carry):
        h, c = carry
        # One (TB,Hp)x(Hp,4Hp) bf16 MXU matmul (f32 accumulation) per step is
        # the only heavy op on the serial h->h chain; sigmoid/tanh go to the
        # EUP slot, the c/h update and mask multiply to the VPU.
        gates = xg_ref[tt].astype(jnp.float32) + jnp.dot(
            h.astype(jnp.bfloat16), wh, preferred_element_type=jnp.float32)
        i_g = jax.nn.sigmoid(gates[:, 0 * Hp:1 * Hp])
        f_g = jax.nn.sigmoid(gates[:, 1 * Hp:2 * Hp])
        g_g = jnp.tanh(gates[:, 2 * Hp:3 * Hp])
        o_g = jax.nn.sigmoid(gates[:, 3 * Hp:4 * Hp])
        c = f_g * c + i_g * g_g
        h = o_g * jnp.tanh(c)
        m = mask_ref[tt]                       # (TB, 1) attention mask
        hts_ref[tt] = h * m                    # masked store (lane-dense vst)
        cts_ref[tt] = c * m                    # recurrence keeps UNMASKED h/c
        return h, c

    # fori_loop bounds live ranges (a static Python `for` keeps TT copies of
    # the gates alive and spills); unroll=True keeps scheduler visibility.
    h, c = jax.lax.fori_loop(0, TT, step, (h_sc[...], c_sc[...]), unroll=True)
    h_sc[...] = h
    c_sc[...] = c


def _round_up(n, m):
    return (n + m - 1) // m * m


def _vmem_capacity_bytes():
    # Per-TensorCore physical VMEM; fall back to the most constrained
    # generation (v7x: 64 MiB/TC) if the query is unavailable.
    try:
        return int(pltpu.get_tpu_info().vmem_capacity_bytes)
    except Exception:
        return 64 * 2 ** 20


def _chip_has_two_tensorcores():
    # Only v7x-class chips expose 2 TensorCores behind one Pallas grid
    # (sharded via "parallel" dimension_semantics).  On 1-TC v5e/v6e a batch
    # split just doubles the serial recurrence length, so gate it here.
    try:
        kind = jax.devices()[0].device_kind.lower()
    except Exception:
        return False
    return "v7" in kind


@functools.partial(jax.jit, static_argnames=("time_block",))
def lstm_layer_forward(x, params, attention_mask, nonzero_index,
                       h_0=None, c_0=None, *, time_block=16):
    """Mirrors LSTMLayer.forward.

    x:               (B, T, D_in) float32
    attention_mask:  (B, T)       float32
    nonzero_index:   (B, 1)       int32 -- must point at positions where
                     attention_mask == 1 (true for "last valid token" usage),
                     since the mask multiply is fused into the kernel stores.
    h_0 / c_0:       optional (B, 1, H), the PyTorch module's convention.
    returns (hts, hts, cts, cls_token)
    """
    B, T, D_in = x.shape
    H = params["wh"].shape[0]

    Hp = _round_up(H, 128)          # lane-aligned hidden size
    Bp = _round_up(B, 8)            # sublane-aligned batch

    # Batch split only where it buys real parallelism (2-TC chips) and the
    # per-core tile stays MXU-friendly (>= 128 rows).
    if _chip_has_two_tensorcores() and Bp >= 256 and Bp % 16 == 0:
        TB = Bp // 2
    else:
        TB = Bp

    cap = _vmem_capacity_bytes()

    def est_bytes(tt):
        # Double-buffered pipeline blocks + (still 2x-buffered) resident Wh
        # + carry scratch.  The mask block counts its 128-lane padding.
        return (2 * TB * tt * 4 * Hp * 2        # xg blocks (bf16)
                + 2 * tt * TB * 128 * 4         # mask blocks (f32, lane-padded)
                + 2 * Hp * 4 * Hp * 2           # Wh (bf16, 2 pipeline buffers)
                + 4 * TB * Hp * 4               # h0 / c0 blocks
                + 4 * TB * tt * Hp * 4          # hts / cts output blocks
                + 2 * TB * Hp * 4)              # h / c carry scratch

    TT = max(1, min(int(time_block), T))
    while est_bytes(TT) > int(0.6 * cap) and TT > 1:
        TT //= 2
    Tp = _round_up(T, TT)
    vmem_limit = int(min(max(2 * est_bytes(TT), 16 * 2 ** 20),
                         int(0.85 * cap)))

    def pad_gate_cols(w):
        # (..., 4H) -> (..., 4Hp): pad each of the [i, f, g, o] blocks to Hp.
        parts = jnp.split(w, 4, axis=-1)
        parts = [jnp.pad(p, [(0, 0)] * (p.ndim - 1) + [(0, Hp - H)])
                 for p in parts]
        return jnp.concatenate(parts, axis=-1)

    wx_p = pad_gate_cols(params["wx"])                                   # (D_in, 4Hp)
    wh_p = pad_gate_cols(jnp.pad(params["wh"], ((0, Hp - H), (0, 0))))   # (Hp, 4Hp)
    b_p = pad_gate_cols(params["bx"] + params["bh"])                     # (1, 4Hp)

    # Hoisted input projection: one big parallel matmul off the serial path,
    # produced directly in time-major layout and streamed in bf16.
    xg = jnp.einsum("btd,dg->tbg", x, wx_p) + b_p                        # (T, B, 4Hp)
    xg = jnp.pad(xg.astype(jnp.bfloat16),
                 ((0, Tp - T), (0, Bp - B), (0, 0)))                     # (Tp, Bp, 4Hp)

    mask = jnp.pad(attention_mask.astype(jnp.float32).T,
                   ((0, Tp - T), (0, Bp - B)))[:, :, None]               # (Tp, Bp, 1)

    if h_0 is None:
        h0 = jnp.zeros((Bp, Hp), jnp.float32)
    else:  # (B, 1, H) module convention
        h0 = jnp.pad(h_0[:, 0, :].astype(jnp.float32),
                     ((0, Bp - B), (0, Hp - H)))
    if c_0 is None:
        c0 = jnp.zeros((Bp, Hp), jnp.float32)
    else:
        c0 = jnp.pad(c_0[:, 0, :].astype(jnp.float32),
                     ((0, Bp - B), (0, Hp - H)))

    wh_bf16 = wh_p.astype(jnp.bfloat16)   # MXU-native; halves resident VMEM

    nb, nt = Bp // TB, Tp // TT

    grid_spec = pltpu.PrefetchScalarGridSpec(
        num_scalar_prefetch=0,
        grid=(nb, nt),
        in_specs=[
            pl.BlockSpec((TT, TB, 4 * Hp), lambda b, t: (t, b, 0)),   # xg (time-major)
            pl.BlockSpec((TT, TB, 1), lambda b, t: (t, b, 0)),        # attention mask
            pl.BlockSpec((Hp, 4 * Hp), lambda b, t: (0, 0)),          # Wh (resident)
            pl.BlockSpec((TB, Hp), lambda b, t: (b, 0)),              # h0
            pl.BlockSpec((TB, Hp), lambda b, t: (b, 0)),              # c0
        ],
        out_specs=[
            pl.BlockSpec((TT, TB, Hp), lambda b, t: (t, b, 0)),       # hts
            pl.BlockSpec((TT, TB, Hp), lambda b, t: (t, b, 0)),       # cts
        ],
        scratch_shapes=[
            pltpu.VMEM((TB, Hp), jnp.float32),                        # h carry
            pltpu.VMEM((TB, Hp), jnp.float32),                        # c carry
        ],
    )

    hts_tm, cts_tm = pl.pallas_call(
        _lstm_kernel,
        out_shape=(
            jax.ShapeDtypeStruct((Tp, Bp, Hp), jnp.float32),
            jax.ShapeDtypeStruct((Tp, Bp, Hp), jnp.float32),
        ),
        grid_spec=grid_spec,
        compiler_params=pltpu.CompilerParams(
            dimension_semantics=("parallel", "arbitrary"),   # batch ||, time seq
            vmem_limit_bytes=vmem_limit,
        ),
    )(xg, mask, wh_bf16, h0, c0)

    # Back to (B, T, H); the attention mask was already applied in-kernel.
    hts = jnp.transpose(hts_tm[:T, :B, :H], (1, 0, 2))
    cts = jnp.transpose(cts_tm[:T, :B, :H], (1, 0, 2))

    # cls_token gather; identical to the pre-mask gather of the PyTorch module
    # because nonzero_index points at mask == 1 positions by construction.
    cls_token = jnp.take_along_axis(
        hts, nonzero_index[:, :, None].astype(jnp.int32), axis=1)[:, 0, :]

    return hts, hts, cts, cls_token


def init_params(key, input_dim, hidden_dim, output_dim):
    """Deterministic nn.Linear-style init; packs the 8 projections into
    Wx:(D_in,4H), Wh:(H,4H), bx:(1,4H), bh:(1,4H) with gate order [i,f,g,o]."""
    assert hidden_dim == output_dim, "recurrence requires hidden_dim == output_dim"

    def linear(k, in_dim, out_dim):
        kw, kb = jax.random.split(k)
        bound = 1.0 / jnp.sqrt(in_dim)
        w = jax.random.uniform(kw, (out_dim, in_dim), jnp.float32, -bound, bound)
        b = jax.random.uniform(kb, (out_dim,), jnp.float32, -bound, bound)
        return w, b

    keys = jax.random.split(key, 8)
    w_ii, b_ii = linear(keys[0], input_dim, output_dim)
    w_hi, b_hi = linear(keys[1], hidden_dim, output_dim)
    w_if, b_if = linear(keys[2], input_dim, output_dim)
    w_hf, b_hf = linear(keys[3], hidden_dim, output_dim)
    w_ig, b_ig = linear(keys[4], input_dim, output_dim)
    w_hg, b_hg = linear(keys[5], hidden_dim, output_dim)
    w_io, b_io = linear(keys[6], input_dim, output_dim)
    w_ho, b_ho = linear(keys[7], hidden_dim, output_dim)

    wx = jnp.concatenate([w_ii.T, w_if.T, w_ig.T, w_io.T], axis=1)  # (D_in, 4H)
    wh = jnp.concatenate([w_hi.T, w_hf.T, w_hg.T, w_ho.T], axis=1)  # (H, 4H)
    bx = jnp.concatenate([b_ii, b_if, b_ig, b_io])[None, :]          # (1, 4H)
    bh = jnp.concatenate([b_hi, b_hf, b_hg, b_ho])[None, :]          # (1, 4H)
    return {"wx": wx, "wh": wh, "bx": bx, "bh": bh}


def _reference(x, params, attention_mask, nonzero_index):
    """Pure-JAX float32 reference (lax.scan) of the same forward pass."""
    B, T, _ = x.shape
    H = params["wh"].shape[0]

    def step(carry, xt):
        h, c = carry
        gates = xt @ params["wx"] + params["bx"] + h @ params["wh"] + params["bh"]
        i_g = jax.nn.sigmoid(gates[:, 0 * H:1 * H])
        f_g = jax.nn.sigmoid(gates[:, 1 * H:2 * H])
        g_g = jnp.tanh(gates[:, 2 * H:3 * H])
        o_g = jax.nn.sigmoid(gates[:, 3 * H:4 * H])
        c_new = f_g * c + i_g * g_g
        h_new = o_g * jnp.tanh(c_new)
        return (h_new, c_new), (h_new, c_new)

    init = (jnp.zeros((B, H), jnp.float32), jnp.zeros((B, H), jnp.float32))
    _, (hts_tm, cts_tm) = jax.lax.scan(step, init, jnp.transpose(x, (1, 0, 2)))
    hts = jnp.transpose(hts_tm, (1, 0, 2))
    cts = jnp.transpose(cts_tm, (1, 0, 2))
    cls_token = jnp.take_along_axis(
        hts, nonzero_index[:, :, None].astype(jnp.int32), axis=1)[:, 0, :]
    hts = hts * attention_mask[:, :, None]
    cts = cts * attention_mask[:, :, None]
    return hts, hts, cts, cls_token


if __name__ == "__main__":
    B, T, D_IN, H = 2, 8, 16, 32   # hidden_dim == output_dim == 32

    key = jax.random.PRNGKey(0)
    k_x, k_p, _ = jax.random.split(key, 3)

    x = jax.random.normal(k_x, (B, T, D_IN), jnp.float32)
    params = init_params(k_p, D_IN, H, H)

    # Attention mask: first few tokens valid; nonzero_index = last valid pos.
    valid_len = jnp.array([T, T // 2], dtype=jnp.int32)
    attention_mask = (jnp.arange(T)[None, :] < valid_len[:, None]).astype(jnp.float32)
    nonzero_index = (valid_len - 1)[:, None].astype(jnp.int32)      # (B, 1)

    outs = lstm_layer_forward(x, params, attention_mask, nonzero_index)
    outs = jax.block_until_ready(outs)

    refs = _reference(x, params, attention_mask, nonzero_index)
    # xg and the recurrent matmul run in bf16 (f32 accumulation), so compare
    # against the pure-f32 reference with a bf16-appropriate tolerance.
    for o, r in zip(outs, refs):
        assert o.shape == r.shape
        assert jnp.allclose(o, r, atol=3e-2, rtol=3e-2), \
            float(jnp.max(jnp.abs(o - r)))

    print("KERNEL_OK")
</pallas_src>

<mosaic_0001>
module attributes {stable_mosaic.version = 11 : i64} {
  func.func @_lstm_kernel(%arg0: i32, %arg1: i32, %arg2: memref<8x8x512xbf16, #tpu.memory_space<vmem>>, %arg3: memref<8x8x1xf32, #tpu.memory_space<vmem>>, %arg4: memref<128x512xbf16, #tpu.memory_space<vmem>>, %arg5: memref<8x128xf32, #tpu.memory_space<vmem>>, %arg6: memref<8x128xf32, #tpu.memory_space<vmem>>, %arg7: memref<8x8x128xf32, #tpu.memory_space<vmem>>, %arg8: memref<8x8x128xf32, #tpu.memory_space<vmem>>, %arg9: memref<8x128xf32, #tpu.memory_space<vmem>>, %arg10: memref<8x128xf32, #tpu.memory_space<vmem>>) attributes {dimension_semantics = [#tpu.dimension_semantics<parallel>, #tpu.dimension_semantics<arbitrary>], iteration_bounds = array<i64: 1, 1>, scalar_prefetch = 0 : i64, scratch_operands = 2 : i64, tpu.core_type = #tpu.core_type<tc>, window_params = [{transform_indices = @transform_0, window_bounds = array<i64: 8, 8, 512>}, {transform_indices = @transform_1, window_bounds = array<i64: 8, 8, 1>}, {pipeline_mode = #tpu.pipeline_mode<synchronous>, transform_indices = @transform_2, window_bounds = array<i64: 128, 512>}, {transform_indices = @transform_3, window_bounds = array<i64: 8, 128>}, {transform_indices = @transform_4, window_bounds = array<i64: 8, 128>}, {transform_indices = @transform_5, window_bounds = array<i64: 8, 8, 128>}, {transform_indices = @transform_6, window_bounds = array<i64: 8, 8, 128>}]} {
    %c0_i32 = arith.constant 0 : i32
    %0 = arith.cmpi eq, %arg1, %c0_i32 : i32
    %1 = arith.extui %0 : i1 to i32
    %c0_i32_0 = arith.constant 0 : i32
    %2 = arith.cmpi ne, %1, %c0_i32_0 : i32
    scf.if %2 {
      %c0_106 = arith.constant 0 : index
      %c0_107 = arith.constant 0 : index
      %384 = vector.load %arg5[%c0_106, %c0_107] : memref<8x128xf32, #tpu.memory_space<vmem>>, vector<8x128xf32>
      %c0_108 = arith.constant 0 : index
      %c0_109 = arith.constant 0 : index
      %385 = vector.load %arg9[%c0_108, %c0_109] : memref<8x128xf32, #tpu.memory_space<vmem>>, vector<8x128xf32>
      tpu.vector_store %arg9[%c0_108, %c0_109], %384 {strides = array<i32>} : memref<8x128xf32, #tpu.memory_space<vmem>>, vector<8x128xf32>,
      %c0_110 = arith.constant 0 : index
      %c0_111 = arith.constant 0 : index
      %386 = vector.load %arg6[%c0_110, %c0_111] : memref<8x128xf32, #tpu.memory_space<vmem>>, vector<8x128xf32>
      %c0_112 = arith.constant 0 : index
      %c0_113 = arith.constant 0 : index
      %387 = vector.load %arg10[%c0_112, %c0_113] : memref<8x128xf32, #tpu.memory_space<vmem>>, vector<8x128xf32>
      tpu.vector_store %arg10[%c0_112, %c0_113], %386 {strides = array<i32>} : memref<8x128xf32, #tpu.memory_space<vmem>>, vector<8x128xf32>,
    } else {
    }
    %c0 = arith.constant 0 : index
    %c0_1 = arith.constant 0 : index
    %3 = vector.load %arg4[%c0, %c0_1] : memref<128x512xbf16, #tpu.memory_space<vmem>>, vector<128x512xbf16>
    %c0_2 = arith.constant 0 : index
    %c0_3 = arith.constant 0 : index
    %4 = vector.load %arg9[%c0_2, %c0_3] : memref<8x128xf32, #tpu.memory_space<vmem>>, vector<8x128xf32>
    %c0_4 = arith.constant 0 : index
    %c0_5 = arith.constant 0 : index
    %5 = vector.load %arg10[%c0_4, %c0_5] : memref<8x128xf32, #tpu.memory_space<vmem>>, vector<8x128xf32>
    %c0_i32_6 = arith.constant 0 : i32
    %6 = arith.index_cast %c0_i32_6 : i32 to index
    %c0_7 = arith.constant 0 : index
    %c0_8 = arith.constant 0 : index
    %7 = vector.load %arg2[%6, %c0_7, %c0_8] : memref<8x8x512xbf16, #tpu.memory_space<vmem>>, vector<1x8x512xbf16>
    %8 = vector.shape_cast %7 : vector<1x8x512xbf16> to vector<8x512xbf16>
    %9 = arith.extf %8 : vector<8x512xbf16> to vector<8x512xf32>
    %10 = arith.truncf %4 : vector<8x128xf32> to vector<8x128xbf16>
    %cst = arith.constant dense<0.000000e+00> : vector<8x512xf32>
    %11 = tpu.matmul %10, %3, %cst {dimension_numbers = #tpu.dot_dimension_numbers<[1], [0], [0], [1], [0, 0, 1, 1], [], []>} : vector<8x128xbf16>, vector<128x512xbf16>, vector<8x512xf32> -> vector<8x512xf32>
    %12 = arith.addf %9, %11 : vector<8x512xf32>
    %13 = vector.extract_strided_slice %12 {offsets = [0, 0], sizes = [8, 128], strides = [1, 1]} : vector<8x512xf32> to vector<8x128xf32>
    %14 = arith.negf %13 : vector<8x128xf32>
    %15 = math.exp %14 : vector<8x128xf32>
    %cst_9 = arith.constant 1.000000e+00 : f32
    %16 = vector.broadcast %cst_9 : f32 to vector<8x128xf32>
    %17 = arith.addf %16, %15 : vector<8x128xf32>
    %18 = arith.divf %16, %17 : vector<8x128xf32>
    %19 = vector.extract_strided_slice %12 {offsets = [0, 128], sizes = [8, 128], strides = [1, 1]} : vector<8x512xf32> to vector<8x128xf32>
    %20 = arith.negf %19 : vector<8x128xf32>
    %21 = math.exp %20 : vector<8x128xf32>
    %cst_10 = arith.constant 1.000000e+00 : f32
    %22 = vector.broadcast %cst_10 : f32 to vector<8x128xf32>
    %23 = arith.addf %22, %21 : vector<8x128xf32>
    %24 = arith.divf %22, %23 : vector<8x128xf32>
    %25 = vector.extract_strided_slice %12 {offsets = [0, 256], sizes = [8, 128], strides = [1, 1]} : vector<8x512xf32> to vector<8x128xf32>
    %26 = math.tanh %25 : vector<8x128xf32>
    %27 = vector.extract_strided_slice %12 {offsets = [0, 384], sizes = [8, 128], strides = [1, 1]} : vector<8x512xf32> to vector<8x128xf32>
    %28 = arith.negf %27 : vector<8x128xf32>
    %29 = math.exp %28 : vector<8x128xf32>
    %cst_11 = arith.constant 1.000000e+00 : f32
    %30 = vector.broadcast %cst_11 : f32 to vector<8x128xf32>
    %31 = arith.addf %30, %29 : vector<8x128xf32>
    %32 = arith.divf %30, %31 : vector<8x128xf32>
    %33 = arith.mulf %24, %5 : vector<8x128xf32>
    %34 = arith.mulf %18, %26 : vector<8x128xf32>
    %35 = arith.addf %33, %34 : vector<8x128xf32>
    %36 = math.tanh %35 : vector<8x128xf32>
    %37 = arith.mulf %32, %36 : vector<8x128xf32>
    %38 = arith.index_cast %c0_i32_6 : i32 to index
    %c0_12 = arith.constant 0 : index
    %c0_13 = arith.constant 0 : index
    %39 = vector.load %arg3[%38, %c0_12, %c0_13] : memref<8x8x1xf32, #tpu.memory_space<vmem>>, vector<1x8x1xf32>
    %40 = vector.shape_cast %39 : vector<1x8x1xf32> to vector<8x1xf32>
    %41 = vector.broadcast %40 : vector<8x1xf32> to vector<8x128xf32>
    %42 = arith.mulf %37, %41 : vector<8x128xf32>
    %43 = arith.index_cast %c0_i32_6 : i32 to index
    %c0_14 = arith.constant 0 : index
    %c0_15 = arith.constant 0 : index
    %44 = vector.load %arg7[%43, %c0_14, %c0_15] : memref<8x8x128xf32, #tpu.memory_space<vmem>>, vector<1x8x128xf32>
    %45 = vector.shape_cast %44 : vector<1x8x128xf32> to vector<8x128xf32>
    %46 = vector.shape_cast %42 : vector<8x128xf32> to vector<1x8x128xf32>
    tpu.vector_store %arg7[%43, %c0_14, %c0_15], %46 {strides = array<i32>} : memref<8x8x128xf32, #tpu.memory_space<vmem>>, vector<1x8x128xf32>,
    %47 = vector.broadcast %40 : vector<8x1xf32> to vector<8x128xf32>
    %48 = arith.mulf %35, %47 : vector<8x128xf32>
    %49 = arith.index_cast %c0_i32_6 : i32 to index
    %c0_16 = arith.constant 0 : index
    %c0_17 = arith.constant 0 : index
    %50 = vector.load %arg8[%49, %c0_16, %c0_17] : memref<8x8x128xf32, #tpu.memory_space<vmem>>, vector<1x8x128xf32>
    %51 = vector.shape_cast %50 : vector<1x8x128xf32> to vector<8x128xf32>
    %52 = vector.shape_cast %48 : vector<8x128xf32> to vector<1x8x128xf32>
    tpu.vector_store %arg8[%49, %c0_16, %c0_17], %52 {strides = array<i32>} : memref<8x8x128xf32, #tpu.memory_space<vmem>>, vector<1x8x128xf32>,
    %c1_i32 = arith.constant 1 : i32
    %53 = arith.index_cast %c1_i32 : i32 to index
    %c0_18 = arith.constant 0 : index
    %c0_19 = arith.constant 0 : index
    %54 = vector.load %arg2[%53, %c0_18, %c0_19] : memref<8x8x512xbf16, #tpu.memory_space<vmem>>, vector<1x8x512xbf16>
    %55 = vector.shape_cast %54 : vector<1x8x512xbf16> to vector<8x512xbf16>
    %56 = arith.extf %55 : vector<8x512xbf16> to vector<8x512xf32>
    %57 = arith.truncf %37 : vector<8x128xf32> to vector<8x128xbf16>
    %cst_20 = arith.constant dense<0.000000e+00> : vector<8x512xf32>
    %58 = tpu.matmul %57, %3, %cst_20 {dimension_numbers = #tpu.dot_dimension_numbers<[1], [0], [0], [1], [0, 0, 1, 1], [], []>} : vector<8x128xbf16>, vector<128x512xbf16>, vector<8x512xf32> -> vector<8x512xf32>
    %59 = arith.addf %56, %58 : vector<8x512xf32>
    %60 = vector.extract_strided_slice %59 {offsets = [0, 0], sizes = [8, 128], strides = [1, 1]} : vector<8x512xf32> to vector<8x128xf32>
    %61 = arith.negf %60 : vector<8x128xf32>
    %62 = math.exp %61 : vector<8x128xf32>
    %cst_21 = arith.constant 1.000000e+00 : f32
    %63 = vector.broadcast %cst_21 : f32 to vector<8x128xf32>
    %64 = arith.addf %63, %62 : vector<8x128xf32>
    %65 = arith.divf %63, %64 : vector<8x128xf32>
    %66 = vector.extract_strided_slice %59 {offsets = [0, 128], sizes = [8, 128], strides = [1, 1]} : vector<8x512xf32> to vector<8x128xf32>
    %67 = arith.negf %66 : vector<8x128xf32>
    %68 = math.exp %67 : vector<8x128xf32>
    %cst_22 = arith.constant 1.000000e+00 : f32
    %69 = vector.broadcast %cst_22 : f32 to vector<8x128xf32>
    %70 = arith.addf %69, %68 : vector<8x128xf32>
    %71 = arith.divf %69, %70 : vector<8x128xf32>
    %72 = vector.extract_strided_slice %59 {offsets = [0, 256], sizes = [8, 128], strides = [1, 1]} : vector<8x512xf32> to vector<8x128xf32>
    %73 = math.tanh %72 : vector<8x128xf32>
    %74 = vector.extract_strided_slice %59 {offsets = [0, 384], sizes = [8, 128], strides = [1, 1]} : vector<8x512xf32> to vector<8x128xf32>
    %75 = arith.negf %74 : vector<8x128xf32>
    %76 = math.exp %75 : vector<8x128xf32>
    %cst_23 = arith.constant 1.000000e+00 : f32
    %77 = vector.broadcast %cst_23 : f32 to vector<8x128xf32>
    %78 = arith.addf %77, %76 : vector<8x128xf32>
    %79 = arith.divf %77, %78 : vector<8x128xf32>
    %80 = arith.mulf %71, %35 : vector<8x128xf32>
    %81 = arith.mulf %65, %73 : vector<8x128xf32>
    %82 = arith.addf %80, %81 : vector<8x128xf32>
    %83 = math.tanh %82 : vector<8x128xf32>
    %84 = arith.mulf %79, %83 : vector<8x128xf32>
    %85 = arith.index_cast %c1_i32 : i32 to index
    %c0_24 = arith.constant 0 : index
    %c0_25 = arith.constant 0 : index
    %86 = vector.load %arg3[%85, %c0_24, %c0_25] : memref<8x8x1xf32, #tpu.memory_space<vmem>>, vector<1x8x1xf32>
    %87 = vector.shape_cast %86 : vector<1x8x1xf32> to vector<8x1xf32>
    %88 = vector.broadcast %87 : vector<8x1xf32> to vector<8x128xf32>
    %89 = arith.mulf %84, %88 : vector<8x128xf32>
    %90 = arith.index_cast %c1_i32 : i32 to index
    %c0_26 = arith.constant 0 : index
    %c0_27 = arith.constant 0 : index
    %91 = vector.load %arg7[%90, %c0_26, %c0_27] : memref<8x8x128xf32, #tpu.memory_space<vmem>>, vector<1x8x128xf32>
    %92 = vector.shape_cast %91 : vector<1x8x128xf32> to vector<8x128xf32>
    %93 = vector.shape_cast %89 : vector<8x128xf32> to vector<1x8x128xf32>
    tpu.vector_store %arg7[%90, %c0_26, %c0_27], %93 {strides = array<i32>} : memref<8x8x128xf32, #tpu.memory_space<vmem>>, vector<1x8x128xf32>,
    %94 = vector.broadcast %87 : vector<8x1xf32> to vector<8x128xf32>
    %95 = arith.mulf %82, %94 : vector<8x128xf32>
    %96 = arith.index_cast %c1_i32 : i32 to index
    %c0_28 = arith.constant 0 : index
    %c0_29 = arith.constant 0 : index
    %97 = vector.load %arg8[%96, %c0_28, %c0_29] : memref<8x8x128xf32, #tpu.memory_space<vmem>>, vector<1x8x128xf32>
    %98 = vector.shape_cast %97 : vector<1x8x128xf32> to vector<8x128xf32>
    %99 = vector.shape_cast %95 : vector<8x128xf32> to vector<1x8x128xf32>
    tpu.vector_store %arg8[%96, %c0_28, %c0_29], %99 {strides = array<i32>} : memref<8x8x128xf32, #tpu.memory_space<vmem>>, vector<1x8x128xf32>,
    %c2_i32 = arith.constant 2 : i32
    %100 = arith.index_cast %c2_i32 : i32 to index
    %c0_30 = arith.constant 0 : index
    %c0_31 = arith.constant 0 : index
    %101 = vector.load %arg2[%100, %c0_30, %c0_31] : memref<8x8x512xbf16, #tpu.memory_space<vmem>>, vector<1x8x512xbf16>
    %102 = vector.shape_cast %101 : vector<1x8x512xbf16> to vector<8x512xbf16>
    %103 = arith.extf %102 : vector<8x512xbf16> to vector<8x512xf32>
    %104 = arith.truncf %84 : vector<8x128xf32> to vector<8x128xbf16>
    %cst_32 = arith.constant dense<0.000000e+00> : vector<8x512xf32>
    %105 = tpu.matmul %104, %3, %cst_32 {dimension_numbers = #tpu.dot_dimension_numbers<[1], [0], [0], [1], [0, 0, 1, 1], [], []>} : vector<8x128xbf16>, vector<128x512xbf16>, vector<8x512xf32> -> vector<8x512xf32>
    %106 = arith.addf %103, %105 : vector<8x512xf32>
    %107 = vector.extract_strided_slice %106 {offsets = [0, 0], sizes = [8, 128], strides = [1, 1]} : vector<8x512xf32> to vector<8x128xf32>
    %108 = arith.negf %107 : vector<8x128xf32>
    %109 = math.exp %108 : vector<8x128xf32>
    %cst_33 = arith.constant 1.000000e+00 : f32
    %110 = vector.broadcast %cst_33 : f32 to vector<8x128xf32>
    %111 = arith.addf %110, %109 : vector<8x128xf32>
    %112 = arith.divf %110, %111 : vector<8x128xf32>
    %113 = vector.extract_strided_slice %106 {offsets = [0, 128], sizes = [8, 128], strides = [1, 1]} : vector<8x512xf32> to vector<8x128xf32>
    %114 = arith.negf %113 : vector<8x128xf32>
    %115 = math.exp %114 : vector<8x128xf32>
    %cst_34 = arith.constant 1.000000e+00 : f32
    %116 = vector.broadcast %cst_34 : f32 to vector<8x128xf32>
    %117 = arith.addf %116, %115 : vector<8x128xf32>
    %118 = arith.divf %116, %117 : vector<8x128xf32>
    %119 = vector.extract_strided_slice %106 {offsets = [0, 256], sizes = [8, 128], strides = [1, 1]} : vector<8x512xf32> to vector<8x128xf32>
    %120 = math.tanh %119 : vector<8x128xf32>
    %121 = vector.extract_strided_slice %106 {offsets = [0, 384], sizes = [8, 128], strides = [1, 1]} : vector<8x512xf32> to vector<8x128xf32>
    %122 = arith.negf %121 : vector<8x128xf32>
    %123 = math.exp %122 : vector<8x128xf32>
    %cst_35 = arith.constant 1.000000e+00 : f32
    %124 = vector.broadcast %cst_35 : f32 to vector<8x128xf32>
    %125 = arith.addf %124, %123 : vector<8x128xf32>
    %126 = arith.divf %124, %125 : vector<8x128xf32>
    %127 = arith.mulf %118, %82 : vector<8x128xf32>
    %128 = arith.mulf %112, %120 : vector<8x128xf32>
    %129 = arith.addf %127, %128 : vector<8x128xf32>
    %130 = math.tanh %129 : vector<8x128xf32>
    %131 = arith.mulf %126, %130 : vector<8x128xf32>
    %132 = arith.index_cast %c2_i32 : i32 to index
    %c0_36 = arith.constant 0 : index
    %c0_37 = arith.constant 0 : index
    %133 = vector.load %arg3[%132, %c0_36, %c0_37] : memref<8x8x1xf32, #tpu.memory_space<vmem>>, vector<1x8x1xf32>
    %134 = vector.shape_cast %133 : vector<1x8x1xf32> to vector<8x1xf32>
    %135 = vector.broadcast %134 : vector<8x1xf32> to vector<8x128xf32>
    %136 = arith.mulf %131, %135 : vector<8x128xf32>
    %137 = arith.index_cast %c2_i32 : i32 to index
    %c0_38 = arith.constant 0 : index
    %c0_39 = arith.constant 0 : index
    %138 = vector.load %arg7[%137, %c0_38, %c0_39] : memref<8x8x128xf32, #tpu.memory_space<vmem>>, vector<1x8x128xf32>
    %139 = vector.shape_cast %138 : vector<1x8x128xf32> to vector<8x128xf32>
    %140 = vector.shape_cast %136 : vector<8x128xf32> to vector<1x8x128xf32>
    tpu.vector_store %arg7[%137, %c0_38, %c0_39], %140 {strides = array<i32>} : memref<8x8x128xf32, #tpu.memory_space<vmem>>, vector<1x8x128xf32>,
    %141 = vector.broadcast %134 : vector<8x1xf32> to vector<8x128xf32>
    %142 = arith.mulf %129, %141 : vector<8x128xf32>
    %143 = arith.index_cast %c2_i32 : i32 to index
    %c0_40 = arith.constant 0 : index
    %c0_41 = arith.constant 0 : index
    %144 = vector.load %arg8[%143, %c0_40, %c0_41] : memref<8x8x128xf32, #tpu.memory_space<vmem>>, vector<1x8x128xf32>
    %145 = vector.shape_cast %144 : vector<1x8x128xf32> to vector<8x128xf32>
    %146 = vector.shape_cast %142 : vector<8x128xf32> to vector<1x8x128xf32>
    tpu.vector_store %arg8[%143, %c0_40, %c0_41], %146 {strides = array<i32>} : memref<8x8x128xf32, #tpu.memory_space<vmem>>, vector<1x8x128xf32>,
    %c3_i32 = arith.constant 3 : i32
    %147 = arith.index_cast %c3_i32 : i32 to index
    %c0_42 = arith.constant 0 : index
    %c0_43 = arith.constant 0 : index
    %148 = vector.load %arg2[%147, %c0_42, %c0_43] : memref<8x8x512xbf16, #tpu.memory_space<vmem>>, vector<1x8x512xbf16>
    %149 = vector.shape_cast %148 : vector<1x8x512xbf16> to vector<8x512xbf16>
    %150 = arith.extf %149 : vector<8x512xbf16> to vector<8x512xf32>
    %151 = arith.truncf %131 : vector<8x128xf32> to vector<8x128xbf16>
    %cst_44 = arith.constant dense<0.000000e+00> : vector<8x512xf32>
    %152 = tpu.matmul %151, %3, %cst_44 {dimension_numbers = #tpu.dot_dimension_numbers<[1], [0], [0], [1], [0, 0, 1, 1], [], []>} : vector<8x128xbf16>, vector<128x512xbf16>, vector<8x512xf32> -> vector<8x512xf32>
    %153 = arith.addf %150, %152 : vector<8x512xf32>
    %154 = vector.extract_strided_slice %153 {offsets = [0, 0], sizes = [8, 128], strides = [1, 1]} : vector<8x512xf32> to vector<8x128xf32>
    %155 = arith.negf %154 : vector<8x128xf32>
    %156 = math.exp %155 : vector<8x128xf32>
    %cst_45 = arith.constant 1.000000e+00 : f32
    %157 = vector.broadcast %cst_45 : f32 to vector<8x128xf32>
    %158 = arith.addf %157, %156 : vector<8x128xf32>
    %159 = arith.divf %157, %158 : vector<8x128xf32>
    %160 = vector.extract_strided_slice %153 {offsets = [0, 128], sizes = [8, 128], strides = [1, 1]} : vector<8x512xf32> to vector<8x128xf32>
    %161 = arith.negf %160 : vector<8x128xf32>
    %162 = math.exp %161 : vector<8x128xf32>
    %cst_46 = arith.constant 1.000000e+00 : f32
    %163 = vector.broadcast %cst_46 : f32 to vector<8x128xf32>
    %164 = arith.addf %163, %162 : vector<8x128xf32>
    %165 = arith.divf %163, %164 : vector<8x128xf32>
    %166 = vector.extract_strided_slice %153 {offsets = [0, 256], sizes = [8, 128], strides = [1, 1]} : vector<8x512xf32> to vector<8x128xf32>
    %167 = math.tanh %166 : vector<8x128xf32>
    %168 = vector.extract_strided_slice %153 {offsets = [0, 384], sizes = [8, 128], strides = [1, 1]} : vector<8x512xf32> to vector<8x128xf32>
    %169 = arith.negf %168 : vector<8x128xf32>
    %170 = math.exp %169 : vector<8x128xf32>
    %cst_47 = arith.constant 1.000000e+00 : f32
    %171 = vector.broadcast %cst_47 : f32 to vector<8x128xf32>
    %172 = arith.addf %171, %170 : vector<8x128xf32>
    %173 = arith.divf %171, %172 : vector<8x128xf32>
    %174 = arith.mulf %165, %129 : vector<8x128xf32>
    %175 = arith.mulf %159, %167 : vector<8x128xf32>
    %176 = arith.addf %174, %175 : vector<8x128xf32>
    %177 = math.tanh %176 : vector<8x128xf32>
    %178 = arith.mulf %173, %177 : vector<8x128xf32>
    %179 = arith.index_cast %c3_i32 : i32 to index
    %c0_48 = arith.constant 0 : index
    %c0_49 = arith.constant 0 : index
    %180 = vector.load %arg3[%179, %c0_48, %c0_49] : memref<8x8x1xf32, #tpu.memory_space<vmem>>, vector<1x8x1xf32>
    %181 = vector.shape_cast %180 : vector<1x8x1xf32> to vector<8x1xf32>
    %182 = vector.broadcast %181 : vector<8x1xf32> to vector<8x128xf32>
    %183 = arith.mulf %178, %182 : vector<8x128xf32>
    %184 = arith.index_cast %c3_i32 : i32 to index
    %c0_50 = arith.constant 0 : index
    %c0_51 = arith.constant 0 : index
    %185 = vector.load %arg7[%184, %c0_50, %c0_51] : memref<8x8x128xf32, #tpu.memory_space<vmem>>, vector<1x8x128xf32>
    %186 = vector.shape_cast %185 : vector<1x8x128xf32> to vector<8x128xf32>
    %187 = vector.shape_cast %183 : vector<8x128xf32> to vector<1x8x128xf32>
    tpu.vector_store %arg7[%184, %c0_50, %c0_51], %187 {strides = array<i32>} : memref<8x8x128xf32, #tpu.memory_space<vmem>>, vector<1x8x128xf32>,
    %188 = vector.broadcast %181 : vector<8x1xf32> to vector<8x128xf32>
    %189 = arith.mulf %176, %188 : vector<8x128xf32>
    %190 = arith.index_cast %c3_i32 : i32 to index
    %c0_52 = arith.constant 0 : index
    %c0_53 = arith.constant 0 : index
    %191 = vector.load %arg8[%190, %c0_52, %c0_53] : memref<8x8x128xf32, #tpu.memory_space<vmem>>, vector<1x8x128xf32>
    %192 = vector.shape_cast %191 : vector<1x8x128xf32> to vector<8x128xf32>
    %193 = vector.shape_cast %189 : vector<8x128xf32> to vector<1x8x128xf32>
    tpu.vector_store %arg8[%190, %c0_52, %c0_53], %193 {strides = array<i32>} : memref<8x8x128xf32, #tpu.memory_space<vmem>>, vector<1x8x128xf32>,
    %c4_i32 = arith.constant 4 : i32
    %194 = arith.index_cast %c4_i32 : i32 to index
    %c0_54 = arith.constant 0 : index
    %c0_55 = arith.constant 0 : index
    %195 = vector.load %arg2[%194, %c0_54, %c0_55] : memref<8x8x512xbf16, #tpu.memory_space<vmem>>, vector<1x8x512xbf16>
    %196 = vector.shape_cast %195 : vector<1x8x512xbf16> to vector<8x512xbf16>
    %197 = arith.extf %196 : vector<8x512xbf16> to vector<8x512xf32>
    %198 = arith.truncf %178 : vector<8x128xf32> to vector<8x128xbf16>
    %cst_56 = arith.constant dense<0.000000e+00> : vector<8x512xf32>
    %199 = tpu.matmul %198, %3, %cst_56 {dimension_numbers = #tpu.dot_dimension_numbers<[1], [0], [0], [1], [0, 0, 1, 1], [], []>} : vector<8x128xbf16>, vector<128x512xbf16>, vector<8x512xf32> -> vector<8x512xf32>
    %200 = arith.addf %197, %199 : vector<8x512xf32>
    %201 = vector.extract_strided_slice %200 {offsets = [0, 0], sizes = [8, 128], strides = [1, 1]} : vector<8x512xf32> to vector<8x128xf32>
    %202 = arith.negf %201 : vector<8x128xf32>
    %203 = math.exp %202 : vector<8x128xf32>
    %cst_57 = arith.constant 1.000000e+00 : f32
    %204 = vector.broadcast %cst_57 : f32 to vector<8x128xf32>
    %205 = arith.addf %204, %203 : vector<8x128xf32>
    %206 = arith.divf %204, %205 : vector<8x128xf32>
    %207 = vector.extract_strided_slice %200 {offsets = [0, 128], sizes = [8, 128], strides = [1, 1]} : vector<8x512xf32> to vector<8x128xf32>
    %208 = arith.negf %207 : vector<8x128xf32>
    %209 = math.exp %208 : vector<8x128xf32>
    %cst_58 = arith.constant 1.000000e+00 : f32
    %210 = vector.broadcast %cst_58 : f32 to vector<8x128xf32>
    %211 = arith.addf %210, %209 : vector<8x128xf32>
    %212 = arith.divf %210, %211 : vector<8x128xf32>
    %213 = vector.extract_strided_slice %200 {offsets = [0, 256], sizes = [8, 128], strides = [1, 1]} : vector<8x512xf32> to vector<8x128xf32>
    %214 = math.tanh %213 : vector<8x128xf32>
    %215 = vector.extract_strided_slice %200 {offsets = [0, 384], sizes = [8, 128], strides = [1, 1]} : vector<8x512xf32> to vector<8x128xf32>
    %216 = arith.negf %215 : vector<8x128xf32>
    %217 = math.exp %216 : vector<8x128xf32>
    %cst_59 = arith.constant 1.000000e+00 : f32
    %218 = vector.broadcast %cst_59 : f32 to vector<8x128xf32>
    %219 = arith.addf %218, %217 : vector<8x128xf32>
    %220 = arith.divf %218, %219 : vector<8x128xf32>
    %221 = arith.mulf %212, %176 : vector<8x128xf32>
    %222 = arith.mulf %206, %214 : vector<8x128xf32>
    %223 = arith.addf %221, %222 : vector<8x128xf32>
    %224 = math.tanh %223 : vector<8x128xf32>
    %225 = arith.mulf %220, %224 : vector<8x128xf32>
    %226 = arith.index_cast %c4_i32 : i32 to index
    %c0_60 = arith.constant 0 : index
    %c0_61 = arith.constant 0 : index
    %227 = vector.load %arg3[%226, %c0_60, %c0_61] : memref<8x8x1xf32, #tpu.memory_space<vmem>>, vector<1x8x1xf32>
    %228 = vector.shape_cast %227 : vector<1x8x1xf32> to vector<8x1xf32>
    %229 = vector.broadcast %228 : vector<8x1xf32> to vector<8x128xf32>
    %230 = arith.mulf %225, %229 : vector<8x128xf32>
    %231 = arith.index_cast %c4_i32 : i32 to index
    %c0_62 = arith.constant 0 : index
    %c0_63 = arith.constant 0 : index
    %232 = vector.load %arg7[%231, %c0_62, %c0_63] : memref<8x8x128xf32, #tpu.memory_space<vmem>>, vector<1x8x128xf32>
    %233 = vector.shape_cast %232 : vector<1x8x128xf32> to vector<8x128xf32>
    %234 = vector.shape_cast %230 : vector<8x128xf32> to vector<1x8x128xf32>
    tpu.vector_store %arg7[%231, %c0_62, %c0_63], %234 {strides = array<i32>} : memref<8x8x128xf32, #tpu.memory_space<vmem>>, vector<1x8x128xf32>,
    %235 = vector.broadcast %228 : vector<8x1xf32> to vector<8x128xf32>
    %236 = arith.mulf %223, %235 : vector<8x128xf32>
    %237 = arith.index_cast %c4_i32 : i32 to index
    %c0_64 = arith.constant 0 : index
    %c0_65 = arith.constant 0 : index
    %238 = vector.load %arg8[%237, %c0_64, %c0_65] : memref<8x8x128xf32, #tpu.memory_space<vmem>>, vector<1x8x128xf32>
    %239 = vector.shape_cast %238 : vector<1x8x128xf32> to vector<8x128xf32>
    %240 = vector.shape_cast %236 : vector<8x128xf32> to vector<1x8x128xf32>
    tpu.vector_store %arg8[%237, %c0_64, %c0_65], %240 {strides = array<i32>} : memref<8x8x128xf32, #tpu.memory_space<vmem>>, vector<1x8x128xf32>,
    %c5_i32 = arith.constant 5 : i32
    %241 = arith.index_cast %c5_i32 : i32 to index
    %c0_66 = arith.constant 0 : index
    %c0_67 = arith.constant 0 : index
    %242 = vector.load %arg2[%241, %c0_66, %c0_67] : memref<8x8x512xbf16, #tpu.memory_space<vmem>>, vector<1x8x512xbf16>
    %243 = vector.shape_cast %242 : vector<1x8x512xbf16> to vector<8x512xbf16>
    %244 = arith.extf %243 : vector<8x512xbf16> to vector<8x512xf32>
    %245 = arith.truncf %225 : vector<8x128xf32> to vector<8x128xbf16>
    %cst_68 = arith.constant dense<0.000000e+00> : vector<8x512xf32>
    %246 = tpu.matmul %245, %3, %cst_68 {dimension_numbers = #tpu.dot_dimension_numbers<[1], [0], [0], [1], [0, 0, 1, 1], [], []>} : vector<8x128xbf16>, vector<128x512xbf16>, vector<8x512xf32> -> vector<8x512xf32>
    %247 = arith.addf %244, %246 : vector<8x512xf32>
    %248 = vector.extract_strided_slice %247 {offsets = [0, 0], sizes = [8, 128], strides = [1, 1]} : vector<8x512xf32> to vector<8x128xf32>
    %249 = arith.negf %248 : vector<8x128xf32>
    %250 = math.exp %249 : vector<8x128xf32>
    %cst_69 = arith.constant 1.000000e+00 : f32
    %251 = vector.broadcast %cst_69 : f32 to vector<8x128xf32>
    %252 = arith.addf %251, %250 : vector<8x128xf32>
    %253 = arith.divf %251, %252 : vector<8x128xf32>
    %254 = vector.extract_strided_slice %247 {offsets = [0, 128], sizes = [8, 128], strides = [1, 1]} : vector<8x512xf32> to vector<8x128xf32>
    %255 = arith.negf %254 : vector<8x128xf32>
    %256 = math.exp %255 : vector<8x128xf32>
    %cst_70 = arith.constant 1.000000e+00 : f32
    %257 = vector.broadcast %cst_70 : f32 to vector<8x128xf32>
    %258 = arith.addf %257, %256 : vector<8x128xf32>
    %259 = arith.divf %257, %258 : vector<8x128xf32>
    %260 = vector.extract_strided_slice %247 {offsets = [0, 256], sizes = [8, 128], strides = [1, 1]} : vector<8x512xf32> to vector<8x128xf32>
    %261 = math.tanh %260 : vector<8x128xf32>
    %262 = vector.extract_strided_slice %247 {offsets = [0, 384], sizes = [8, 128], strides = [1, 1]} : vector<8x512xf32> to vector<8x128xf32>
    %263 = arith.negf %262 : vector<8x128xf32>
    %264 = math.exp %263 : vector<8x128xf32>
    %cst_71 = arith.constant 1.000000e+00 : f32
    %265 = vector.broadcast %cst_71 : f32 to vector<8x128xf32>
    %266 = arith.addf %265, %264 : vector<8x128xf32>
    %267 = arith.divf %265, %266 : vector<8x128xf32>
    %268 = arith.mulf %259, %223 : vector<8x128xf32>
    %269 = arith.mulf %253, %261 : vector<8x128xf32>
    %270 = arith.addf %268, %269 : vector<8x128xf32>
    %271 = math.tanh %270 : vector<8x128xf32>
    %272 = arith.mulf %267, %271 : vector<8x128xf32>
    %273 = arith.index_cast %c5_i32 : i32 to index
    %c0_72 = arith.constant 0 : index
    %c0_73 = arith.constant 0 : index
    %274 = vector.load %arg3[%273, %c0_72, %c0_73] : memref<8x8x1xf32, #tpu.memory_space<vmem>>, vector<1x8x1xf32>
    %275 = vector.shape_cast %274 : vector<1x8x1xf32> to vector<8x1xf32>
    %276 = vector.broadcast %275 : vector<8x1xf32> to vector<8x128xf32>
    %277 = arith.mulf %272, %276 : vector<8x128xf32>
    %278 = arith.index_cast %c5_i32 : i32 to index
    %c0_74 = arith.constant 0 : index
    %c0_75 = arith.constant 0 : index
    %279 = vector.load %arg7[%278, %c0_74, %c0_75] : memref<8x8x128xf32, #tpu.memory_space<vmem>>, vector<1x8x128xf32>
    %280 = vector.shape_cast %279 : vector<1x8x128xf32> to vector<8x128xf32>
    %281 = vector.shape_cast %277 : vector<8x128xf32> to vector<1x8x128xf32>
    tpu.vector_store %arg7[%278, %c0_74, %c0_75], %281 {strides = array<i32>} : memref<8x8x128xf32, #tpu.memory_space<vmem>>, vector<1x8x128xf32>,
    %282 = vector.broadcast %275 : vector<8x1xf32> to vector<8x128xf32>
    %283 = arith.mulf %270, %282 : vector<8x128xf32>
    %284 = arith.index_cast %c5_i32 : i32 to index
    %c0_76 = arith.constant 0 : index
    %c0_77 = arith.constant 0 : index
    %285 = vector.load %arg8[%284, %c0_76, %c0_77] : memref<8x8x128xf32, #tpu.memory_space<vmem>>, vector<1x8x128xf32>
    %286 = vector.shape_cast %285 : vector<1x8x128xf32> to vector<8x128xf32>
    %287 = vector.shape_cast %283 : vector<8x128xf32> to vector<1x8x128xf32>
    tpu.vector_store %arg8[%284, %c0_76, %c0_77], %287 {strides = array<i32>} : memref<8x8x128xf32, #tpu.memory_space<vmem>>, vector<1x8x128xf32>,
    %c6_i32 = arith.constant 6 : i32
    %288 = arith.index_cast %c6_i32 : i32 to index
    %c0_78 = arith.constant 0 : index
    %c0_79 = arith.constant 0 : index
    %289 = vector.load %arg2[%288, %c0_78, %c0_79] : memref<8x8x512xbf16, #tpu.memory_space<vmem>>, vector<1x8x512xbf16>
    %290 = vector.shape_cast %289 : vector<1x8x512xbf16> to vector<8x512xbf16>
    %291 = arith.extf %290 : vector<8x512xbf16> to vector<8x512xf32>
    %292 = arith.truncf %272 : vector<8x128xf32> to vector<8x128xbf16>
    %cst_80 = arith.constant dense<0.000000e+00> : vector<8x512xf32>
    %293 = tpu.matmul %292, %3, %cst_80 {dimension_numbers = #tpu.dot_dimension_numbers<[1], [0], [0], [1], [0, 0, 1, 1], [], []>} : vector<8x128xbf16>, vector<128x512xbf16>, vector<8x512xf32> -> vector<8x512xf32>
    %294 = arith.addf %291, %293 : vector<8x512xf32>
    %295 = vector.extract_strided_slice %294 {offsets = [0, 0], sizes = [8, 128], strides = [1, 1]} : vector<8x512xf32> to vector<8x128xf32>
    %296 = arith.negf %295 : vector<8x128xf32>
    %297 = math.exp %296 : vector<8x128xf32>
    %cst_81 = arith.constant 1.000000e+00 : f32
    %298 = vector.broadcast %cst_81 : f32 to vector<8x128xf32>
    %299 = arith.addf %298, %297 : vector<8x128xf32>
    %300 = arith.divf %298, %299 : vector<8x128xf32>
    %301 = vector.extract_strided_slice %294 {offsets = [0, 128], sizes = [8, 128], strides = [1, 1]} : vector<8x512xf32> to vector<8x128xf32>
    %302 = arith.negf %301 : vector<8x128xf32>
    %303 = math.exp %302 : vector<8x128xf32>
    %cst_82 = arith.constant 1.000000e+00 : f32
    %304 = vector.broadcast %cst_82 : f32 to vector<8x128xf32>
    %305 = arith.addf %304, %303 : vector<8x128xf32>
    %306 = arith.divf %304, %305 : vector<8x128xf32>
    %307 = vector.extract_strided_slice %294 {offsets = [0, 256], sizes = [8, 128], strides = [1, 1]} : vector<8x512xf32> to vector<8x128xf32>
    %308 = math.tanh %307 : vector<8x128xf32>
    %309 = vector.extract_strided_slice %294 {offsets = [0, 384], sizes = [8, 128], strides = [1, 1]} : vector<8x512xf32> to vector<8x128xf32>
    %310 = arith.negf %309 : vector<8x128xf32>
    %311 = math.exp %310 : vector<8x128xf32>
    %cst_83 = arith.constant 1.000000e+00 : f32
    %312 = vector.broadcast %cst_83 : f32 to vector<8x128xf32>
    %313 = arith.addf %312, %311 : vector<8x128xf32>
    %314 = arith.divf %312, %313 : vector<8x128xf32>
    %315 = arith.mulf %306, %270 : vector<8x128xf32>
    %316 = arith.mulf %300, %308 : vector<8x128xf32>
    %317 = arith.addf %315, %316 : vector<8x128xf32>
    %318 = math.tanh %317 : vector<8x128xf32>
    %319 = arith.mulf %314, %318 : vector<8x128xf32>
    %320 = arith.index_cast %c6_i32 : i32 to index
    %c0_84 = arith.constant 0 : index
    %c0_85 = arith.constant 0 : index
    %321 = vector.load %arg3[%320, %c0_84, %c0_85] : memref<8x8x1xf32, #tpu.memory_space<vmem>>, vector<1x8x1xf32>
    %322 = vector.shape_cast %321 : vector<1x8x1xf32> to vector<8x1xf32>
    %323 = vector.broadcast %322 : vector<8x1xf32> to vector<8x128xf32>
    %324 = arith.mulf %319, %323 : vector<8x128xf32>
    %325 = arith.index_cast %c6_i32 : i32 to index
    %c0_86 = arith.constant 0 : index
    %c0_87 = arith.constant 0 : index
    %326 = vector.load %arg7[%325, %c0_86, %c0_87] : memref<8x8x128xf32, #tpu.memory_space<vmem>>, vector<1x8x128xf32>
    %327 = vector.shape_cast %326 : vector<1x8x128xf32> to vector<8x128xf32>
    %328 = vector.shape_cast %324 : vector<8x128xf32> to vector<1x8x128xf32>
    tpu.vector_store %arg7[%325, %c0_86, %c0_87], %328 {strides = array<i32>} : memref<8x8x128xf32, #tpu.memory_space<vmem>>, vector<1x8x128xf32>,
    %329 = vector.broadcast %322 : vector<8x1xf32> to vector<8x128xf32>
    %330 = arith.mulf %317, %329 : vector<8x128xf32>
    %331 = arith.index_cast %c6_i32 : i32 to index
    %c0_88 = arith.constant 0 : index
    %c0_89 = arith.constant 0 : index
    %332 = vector.load %arg8[%331, %c0_88, %c0_89] : memref<8x8x128xf32, #tpu.memory_space<vmem>>, vector<1x8x128xf32>
    %333 = vector.shape_cast %332 : vector<1x8x128xf32> to vector<8x128xf32>
    %334 = vector.shape_cast %330 : vector<8x128xf32> to vector<1x8x128xf32>
    tpu.vector_store %arg8[%331, %c0_88, %c0_89], %334 {strides = array<i32>} : memref<8x8x128xf32, #tpu.memory_space<vmem>>, vector<1x8x128xf32>,
    %c7_i32 = arith.constant 7 : i32
    %335 = arith.index_cast %c7_i32 : i32 to index
    %c0_90 = arith.constant 0 : index
    %c0_91 = arith.constant 0 : index
    %336 = vector.load %arg2[%335, %c0_90, %c0_91] : memref<8x8x512xbf16, #tpu.memory_space<vmem>>, vector<1x8x512xbf16>
    %337 = vector.shape_cast %336 : vector<1x8x512xbf16> to vector<8x512xbf16>
    %338 = arith.extf %337 : vector<8x512xbf16> to vector<8x512xf32>
    %339 = arith.truncf %319 : vector<8x128xf32> to vector<8x128xbf16>
    %cst_92 = arith.constant dense<0.000000e+00> : vector<8x512xf32>
    %340 = tpu.matmul %339, %3, %cst_92 {dimension_numbers = #tpu.dot_dimension_numbers<[1], [0], [0], [1], [0, 0, 1, 1], [], []>} : vector<8x128xbf16>, vector<128x512xbf16>, vector<8x512xf32> -> vector<8x512xf32>
    %341 = arith.addf %338, %340 : vector<8x512xf32>
    %342 = vector.extract_strided_slice %341 {offsets = [0, 0], sizes = [8, 128], strides = [1, 1]} : vector<8x512xf32> to vector<8x128xf32>
    %343 = arith.negf %342 : vector<8x128xf32>
    %344 = math.exp %343 : vector<8x128xf32>
    %cst_93 = arith.constant 1.000000e+00 : f32
    %345 = vector.broadcast %cst_93 : f32 to vector<8x128xf32>
    %346 = arith.addf %345, %344 : vector<8x128xf32>
    %347 = arith.divf %345, %346 : vector<8x128xf32>
    %348 = vector.extract_strided_slice %341 {offsets = [0, 128], sizes = [8, 128], strides = [1, 1]} : vector<8x512xf32> to vector<8x128xf32>
    %349 = arith.negf %348 : vector<8x128xf32>
    %350 = math.exp %349 : vector<8x128xf32>
    %cst_94 = arith.constant 1.000000e+00 : f32
    %351 = vector.broadcast %cst_94 : f32 to vector<8x128xf32>
    %352 = arith.addf %351, %350 : vector<8x128xf32>
    %353 = arith.divf %351, %352 : vector<8x128xf32>
    %354 = vector.extract_strided_slice %341 {offsets = [0, 256], sizes = [8, 128], strides = [1, 1]} : vector<8x512xf32> to vector<8x128xf32>
    %355 = math.tanh %354 : vector<8x128xf32>
    %356 = vector.extract_strided_slice %341 {offsets = [0, 384], sizes = [8, 128], strides = [1, 1]} : vector<8x512xf32> to vector<8x128xf32>
    %357 = arith.negf %356 : vector<8x128xf32>
    %358 = math.exp %357 : vector<8x128xf32>
    %cst_95 = arith.constant 1.000000e+00 : f32
    %359 = vector.broadcast %cst_95 : f32 to vector<8x128xf32>
    %360 = arith.addf %359, %358 : vector<8x128xf32>
    %361 = arith.divf %359, %360 : vector<8x128xf32>
    %362 = arith.mulf %353, %317 : vector<8x128xf32>
    %363 = arith.mulf %347, %355 : vector<8x128xf32>
    %364 = arith.addf %362, %363 : vector<8x128xf32>
    %365 = math.tanh %364 : vector<8x128xf32>
    %366 = arith.mulf %361, %365 : vector<8x128xf32>
    %367 = arith.index_cast %c7_i32 : i32 to index
    %c0_96 = arith.constant 0 : index
    %c0_97 = arith.constant 0 : index
    %368 = vector.load %arg3[%367, %c0_96, %c0_97] : memref<8x8x1xf32, #tpu.memory_space<vmem>>, vector<1x8x1xf32>
    %369 = vector.shape_cast %368 : vector<1x8x1xf32> to vector<8x1xf32>
    %370 = vector.broadcast %369 : vector<8x1xf32> to vector<8x128xf32>
    %371 = arith.mulf %366, %370 : vector<8x128xf32>
    %372 = arith.index_cast %c7_i32 : i32 to index
    %c0_98 = arith.constant 0 : index
    %c0_99 = arith.constant 0 : index
    %373 = vector.load %arg7[%372, %c0_98, %c0_99] : memref<8x8x128xf32, #tpu.memory_space<vmem>>, vector<1x8x128xf32>
    %374 = vector.shape_cast %373 : vector<1x8x128xf32> to vector<8x128xf32>
    %375 = vector.shape_cast %371 : vector<8x128xf32> to vector<1x8x128xf32>
    tpu.vector_store %arg7[%372, %c0_98, %c0_99], %375 {strides = array<i32>} : memref<8x8x128xf32, #tpu.memory_space<vmem>>, vector<1x8x128xf32>,
    %376 = vector.broadcast %369 : vector<8x1xf32> to vector<8x128xf32>
    %377 = arith.mulf %364, %376 : vector<8x128xf32>
    %378 = arith.index_cast %c7_i32 : i32 to index
    %c0_100 = arith.constant 0 : index
    %c0_101 = arith.constant 0 : index
    %379 = vector.load %arg8[%378, %c0_100, %c0_101] : memref<8x8x128xf32, #tpu.memory_space<vmem>>, vector<1x8x128xf32>
    %380 = vector.shape_cast %379 : vector<1x8x128xf32> to vector<8x128xf32>
    %381 = vector.shape_cast %377 : vector<8x128xf32> to vector<1x8x128xf32>
    tpu.vector_store %arg8[%378, %c0_100, %c0_101], %381 {strides = array<i32>} : memref<8x8x128xf32, #tpu.memory_space<vmem>>, vector<1x8x128xf32>,
    %c8_i32 = arith.constant 8 : i32
    %c0_102 = arith.constant 0 : index
    %c0_103 = arith.constant 0 : index
    %382 = vector.load %arg9[%c0_102, %c0_103] : memref<8x128xf32, #tpu.memory_space<vmem>>, vector<8x128xf32>
    tpu.vector_store %arg9[%c0_102, %c0_103], %366 {strides = array<i32>} : memref<8x128xf32, #tpu.memory_space<vmem>>, vector<8x128xf32>,
    %c0_104 = arith.constant 0 : index
    %c0_105 = arith.constant 0 : index
    %383 = vector.load %arg10[%c0_104, %c0_105] : memref<8x128xf32, #tpu.memory_space<vmem>>, vector<8x128xf32>
    tpu.vector_store %arg10[%c0_104, %c0_105], %364 {strides = array<i32>} : memref<8x128xf32, #tpu.memory_space<vmem>>, vector<8x128xf32>,
    return
  }
  func.func @transform_0(%arg0: i32, %arg1: i32) -> (i32, i32, i32) {
    %c0_i32 = arith.constant 0 : i32
    %c0_i32_0 = arith.constant 0 : i32
    return %arg1, %arg0, %c0_i32 : i32, i32, i32
  }
  func.func @transform_1(%arg0: i32, %arg1: i32) -> (i32, i32, i32) {
    %c0_i32 = arith.constant 0 : i32
    %c0_i32_0 = arith.constant 0 : i32
    return %arg1, %arg0, %c0_i32 : i32, i32, i32
  }
  func.func @transform_2(%arg0: i32, %arg1: i32) -> (i32, i32) {
    %c0_i32 = arith.constant 0 : i32
    %c0_i32_0 = arith.constant 0 : i32
    %c0_i32_1 = arith.constant 0 : i32
    return %c0_i32, %c0_i32_0 : i32, i32
  }
  func.func @transform_3(%arg0: i32, %arg1: i32) -> (i32, i32) {
    %c0_i32 = arith.constant 0 : i32
    %c0_i32_0 = arith.constant 0 : i32
    return %arg0, %c0_i32 : i32, i32
  }
  func.func @transform_4(%arg0: i32, %arg1: i32) -> (i32, i32) {
    %c0_i32 = arith.constant 0 : i32
    %c0_i32_0 = arith.constant 0 : i32
    return %arg0, %c0_i32 : i32, i32
  }
  func.func @transform_5(%arg0: i32, %arg1: i32) -> (i32, i32, i32) {
    %c0_i32 = arith.constant 0 : i32
    %c0_i32_0 = arith.constant 0 : i32
    return %arg1, %arg0, %c0_i32 : i32, i32, i32
  }
  func.func @transform_6(%arg0: i32, %arg1: i32) -> (i32, i32, i32) {
    %c0_i32 = arith.constant 0 : i32
    %c0_i32_0 = arith.constant 0 : i32
    return %arg1, %arg0, %c0_i32 : i32, i32, i32
  }
}

</mosaic_0001>

<bundles_post_ra>
// kernel: lstm_layer_forward.1
= control target key start
LH: loop header
LB: loop body
LE: loop exit
PB: predicated region body
PF: predicated region fallthrough
CT: control target
= control target key end

     0   :  { %s2410_s2 = inlined_call_operand.vmem [shape: bf16[128,512], index: 2, kind: input, shape index: {}]   ;;  %s2411_s1 = inlined_call_operand.vmem [shape: f32[8,8,1], index: 1, kind: input, shape index: {}]   ;;  %s2412_s3 = inlined_call_operand.vmem [shape: f32[8,128], index: 3, kind: input, shape index: {}, may-alias: {3,4}]   ;;  %s2413_s0 = inlined_call_operand.vmem [shape: bf16[8,8,512], index: 0, kind: input, shape index: {}]   ;;  %s2414_s4 = inlined_call_operand.vmem [shape: f32[8,128], index: 4, kind: input, shape index: {}, may-alias: {3,4}]   ;;  %s2415_s6 = inlined_call_operand.vmem [shape: f32[8,8,128], index: 6, kind: output, shape index: {1}]   ;;  %s2416_s5 = inlined_call_operand.vmem [shape: f32[8,8,128], index: 5, kind: output, shape index: {0}]  }
   0x1   :  { %v1464_v0 = vld [vmem:[%s2410_s2 + $0xe0] sm:$0xf]  ;;  %v1567_v1 = vld [vmem:[%s2410_s2 + $0xec] sm:$0xf0]  ;;  %v1565_v2 = vld [vmem:[%s2410_s2 + $0xe4] sm:$0xf] }
   0x2   :  { %v1746_v3 = vor.u32 %v1567_v1, %v1464_v0  ;;  %v1466_v4 = vld [vmem:[%s2410_s2 + $0xf0] sm:$0xf0]  ;;  %v1566_v5 = vld [vmem:[%s2410_s2 + $0xec] sm:$0xf]  ;;  %v1474_v6 = vld [vmem:[%s2410_s2 + $0xf8] sm:$0xf0] }
   0x3   :  { %v1757_v7 = vor.u32 %v1565_v2, %v1466_v4  ;;  %v1759_v8 = vor.u32 %v1566_v5, %v1474_v6  ;;  %v1448_v9 = vld [vmem:[%s2410_s2 + $0xc0] sm:$0xf]  ;;  %v1563_v10 = vld [vmem:[%s2410_s2 + $0xcc] sm:$0xf0]  ;;  %v1561_v11 = vld [vmem:[%s2410_s2 + $0xc4] sm:$0xf] }
   0x4   :  { %231 = vmatpush.bf16.msra.mxu0 %v1746_v3  ;;  %v1771_v12 = vor.u32 %v1563_v10, %v1448_v9  ;;  %v1450_v13 = vld [vmem:[%s2410_s2 + $0xd0] sm:$0xf0]  ;;  %v1562_v14 = vld [vmem:[%s2410_s2 + $0xcc] sm:$0xf]  ;;  %v1458_v15 = vld [vmem:[%s2410_s2 + $0xd8] sm:$0xf0] }
   0x5   :  { %244 = vmatpush.bf16.msra.mxu1 %v1757_v7  ;;  %270 = vmatpush.bf16.msra.mxu3 %v1759_v8  ;;  %v1784_v16 = vor.u32 %v1561_v11, %v1450_v13  ;;  %v1786_v17 = vor.u32 %v1562_v14, %v1458_v15  ;;  %v1472_v18 = vld [vmem:[%s2410_s2 + $0xe8] sm:$0xf]  ;;  %v1568_v19 = vld [vmem:[%s2410_s2 + $0xf4] sm:$0xf0]  ;;  %v1432_v20 = vld [vmem:[%s2410_s2 + $0xa0] sm:$0xf] }
   0x6   :  { %v1797_v21 = vor.u32 %v1568_v19, %v1472_v18  ;;  %v1559_v22 = vld [vmem:[%s2410_s2 + $0xac] sm:$0xf0]  ;;  %v1557_v23 = vld [vmem:[%s2410_s2 + $0xa4] sm:$0xf]  ;;  %v1434_v24 = vld [vmem:[%s2410_s2 + $0xb0] sm:$0xf0] }
   0x7   :  { %v1558_v25 = vld [vmem:[%s2410_s2 + $0xac] sm:$0xf]  ;;  %v1442_v26 = vld [vmem:[%s2410_s2 + $0xb8] sm:$0xf0]  ;;  %v1456_v27 = vld [vmem:[%s2410_s2 + $0xc8] sm:$0xf]  ;;  %v1819_v28 = vor.u32 %v1559_v22, %v1432_v20  ;;  %v1832_v32 = vor.u32 %v1557_v23, %v1434_v24 }
   0x8   :  { %232 = vmatpush.bf16.msra.mxu0 %v1771_v12  ;;  %257 = vmatpush.bf16.msra.mxu2 %v1797_v21  ;;  %v1564_v29 = vld [vmem:[%s2410_s2 + $0xd4] sm:$0xf0]  ;;  %v1416_v30 = vld [vmem:[%s2410_s2 + $0x80] sm:$0xf]  ;;  %v1555_v31 = vld [vmem:[%s2410_s2 + $0x8c] sm:$0xf0]  ;;  %v1834_v33 = vor.u32 %v1558_v25, %v1442_v26 }
   0x9   :  { %245 = vmatpush.bf16.msra.mxu1 %v1784_v16  ;;  %271 = vmatpush.bf16.msra.mxu3 %v1786_v17  ;;  %v1836_v34 = vor.u32 %v1564_v29, %v1456_v27  ;;  %v1553_v35 = vld [vmem:[%s2410_s2 + $0x84] sm:$0xf]  ;;  %v1418_v36 = vld [vmem:[%s2410_s2 + $0x90] sm:$0xf0]  ;;  %v1554_v37 = vld [vmem:[%s2410_s2 + $0x8c] sm:$0xf]  ;;  %v1858_v41 = vor.u32 %v1555_v31, %v1416_v30 }
   0xa   :  { %v1426_v38 = vld [vmem:[%s2410_s2 + $0x98] sm:$0xf0]  ;;  %v1440_v39 = vld [vmem:[%s2410_s2 + $0xa8] sm:$0xf]  ;;  %v1560_v40 = vld [vmem:[%s2410_s2 + $0xb4] sm:$0xf0]  ;;  %v1870_v45 = vor.u32 %v1553_v35, %v1418_v36 }
   0xb   :  { %v1860_v42 = vor.u32 %v1560_v40, %v1440_v39  ;;  %v1400_v43 = vld [vmem:[%s2410_s2 + $0x60] sm:$0xf]  ;;  %v1551_v44 = vld [vmem:[%s2410_s2 + $0x6c] sm:$0xf0]  ;;  %v1872_v46 = vor.u32 %v1554_v37, %v1426_v38  ;;  %v1549_v47 = vld [vmem:[%s2410_s2 + $0x64] sm:$0xf] }
   0xc   :  { %233 = vmatpush.bf16.msra.mxu0 %v1819_v28  ;;  %258 = vmatpush.bf16.msra.mxu2 %v1836_v34  ;;  %v1424_v48 = vld [vmem:[%s2410_s2 + $0x88] sm:$0xf]  ;;  %v1556_v49 = vld [vmem:[%s2410_s2 + $0x94] sm:$0xf0]  ;;  %v1402_v50 = vld [vmem:[%s2410_s2 + $0x70] sm:$0xf0]  ;;  %v1894_v53 = vor.u32 %v1551_v44, %v1400_v43 }
   0xd   :  { %246 = vmatpush.bf16.msra.mxu1 %v1832_v32  ;;  %272 = vmatpush.bf16.msra.mxu3 %v1834_v33  ;;  %v1550_v51 = vld [vmem:[%s2410_s2 + $0x6c] sm:$0xf]  ;;  %v1410_v52 = vld [vmem:[%s2410_s2 + $0x78] sm:$0xf0]  ;;  %v1896_v54 = vor.u32 %v1556_v49, %v1424_v48  ;;  %v1384_v55 = vld [vmem:[%s2410_s2 + $0x40] sm:$0xf]  ;;  %v1906_v57 = vor.u32 %v1549_v47, %v1402_v50 }
   0xe   :  { %v1547_v56 = vld [vmem:[%s2410_s2 + $0x4c] sm:$0xf0]  ;;  %v1908_v58 = vor.u32 %v1550_v51, %v1410_v52  ;;  %v1545_v59 = vld [vmem:[%s2410_s2 + $0x44] sm:$0xf]  ;;  %v1408_v60 = vld [vmem:[%s2410_s2 + $0x68] sm:$0xf] }
   0xf   :  { %v1552_v61 = vld [vmem:[%s2410_s2 + $0x74] sm:$0xf0]  ;;  %v1386_v62 = vld [vmem:[%s2410_s2 + $0x50] sm:$0xf0]  ;;  %v1546_v63 = vld [vmem:[%s2410_s2 + $0x4c] sm:$0xf]  ;;  %v1933_v2 = vor.u32 %v1547_v56, %v1384_v55 }
  0x10   :  { %234 = vmatpush.bf16.msra.mxu0 %v1858_v41  ;;  %259 = vmatpush.bf16.msra.mxu2 %v1860_v42  ;;  %v1394_v0 = vld [vmem:[%s2410_s2 + $0x58] sm:$0xf0]  ;;  %v1368_v1 = vld [vmem:[%s2410_s2 + $0x20] sm:$0xf]  ;;  %v1935_v4 = vor.u32 %v1552_v61, %v1408_v60  ;;  %v1543_v5 = vld [vmem:[%s2410_s2 + $0x2c] sm:$0xf0]  ;;  %v1948_v10 = vor.u32 %v1545_v59, %v1386_v62 }
  0x11   :  { %247 = vmatpush.bf16.msra.mxu1 %v1870_v45  ;;  %273 = vmatpush.bf16.msra.mxu3 %v1872_v46  ;;  %v1541_v6 = vld [vmem:[%s2410_s2 + $0x24] sm:$0xf]  ;;  %v1370_v9 = vld [vmem:[%s2410_s2 + $0x30] sm:$0xf0]  ;;  %v1950_v11 = vor.u32 %v1546_v63, %v1394_v0  ;;  %v1392_v13 = vld [vmem:[%s2410_s2 + $0x48] sm:$0xf]  ;;  %v1969_v22 = vor.u32 %v1543_v5, %v1368_v1 }
  0x12   :  { %v1548_v14 = vld [vmem:[%s2410_s2 + $0x54] sm:$0xf0]  ;;  %v1542_v15 = vld [vmem:[%s2410_s2 + $0x2c] sm:$0xf]  ;;  %v1378_v18 = vld [vmem:[%s2410_s2 + $0x38] sm:$0xf0]  ;;  %v1981_v26 = vor.u32 %v1541_v6, %v1370_v9 }
  0x13   :  { %v1701_v19 = vmov 0   ;;  %v350_v20 = vld [vmem:[%s2411_s1] sm:$0xff]  ;;  %v1971_v23 = vor.u32 %v1548_v14, %v1392_v13  ;;  %v1539_v25 = vld [vmem:[%s2410_s2 + $0xc] sm:$0xf0]  ;;  %v1983_v27 = vor.u32 %v1542_v15, %v1378_v18  ;;  %v1376_v30 = vld [vmem:[%s2410_s2 + $0x28] sm:$0xf] }
  0x14   :  { %235 = vmatpush.bf16.msra.mxu0 %v1894_v53  ;;  %260 = vmatpush.bf16.msra.mxu2 %v1896_v54  ;;  %v1352_v24 = vld [vmem:[%s2410_s2] sm:$0xf]  ;;  %v1537_v29 = vld [vmem:[%s2410_s2 + $0x4] sm:$0xf]  ;;  %v1544_v31 = vld [vmem:[%s2410_s2 + $0x34] sm:$0xf0] }
  0x15   :  { %248 = vmatpush.bf16.msra.mxu1 %v1906_v57  ;;  %274 = vmatpush.bf16.msra.mxu3 %v1908_v58  ;;  %v1354_v35 = vld [vmem:[%s2410_s2 + $0x10] sm:$0xf0]  ;;  %v1538_v36 = vld [vmem:[%s2410_s2 + $0xc] sm:$0xf]  ;;  %v1362_v37 = vld [vmem:[%s2410_s2 + $0x18] sm:$0xf0]  ;;  %v2005_v38 = vor.u32 %v1539_v25, %v1352_v24  ;;  %v2010_v40 = vor.u32 %v1544_v31, %v1376_v30 }
  0x16   :  { %1570 = vset.pattern.permute.xlu0 %v1701_v19  ;;  %1571 = vset.pattern.permute.xlu1 %v1701_v19  ;;  %v26_v39 = vld [vmem:[%s2412_s3] sm:$0xff]  ;;  %v2014_v43 = vor.u32 %v1537_v29, %v1354_v35  ;;  %v2016_v44 = vor.u32 %v1538_v36, %v1362_v37  ;;  %v1360_v47 = vld [vmem:[%s2410_s2 + $0x8] sm:$0xf]  ;;  %v1540_v48 = vld [vmem:[%s2410_s2 + $0x14] sm:$0xf0] }
  0x17   :  { %353 = vperm.xlu0 %1570, %v350_v20   ;;  %1572 = vset.pattern.permute.xlu2 %v1701_v19  ;;  %v70_v49 = vpack.c.bf16 %v26_v39, %v26_v39  ;;  %v2028_v50 = vor.u32 %v1540_v48, %v1360_v47  ;;  %v64_v51 = vld [vmem:[%s2413_s0] sm:$0xff]  ;;  %v65_v61 = vld [vmem:[%s2413_s0 + $0x8] sm:$0xff] }
  0x18   :  { %236 = vmatpush.bf16.msra.mxu0 %v1933_v2  ;;  %261 = vmatpush.bf16.msra.mxu2 %v1935_v4  ;;  %v66_v52 = vunpack.c.l.bf16 %v64_v51  ;;  %v67_v55 = vunpack.c.h.bf16 %v64_v51  ;;  %v69_v1 = vunpack.c.h.bf16 %v65_v61  ;;  %v68_v25 = vunpack.c.l.bf16 %v65_v61  ;;  %v1486_v30 = vld [vmem:[%s2411_s1 + $0x8] sm:$0xff] }
  0x19   :  { %249 = vmatpush.bf16.msra.mxu1 %v1948_v10  ;;  %275 = vmatpush.bf16.msra.mxu3 %v1950_v11 }
  0x1c   :  { %237 = vmatpush.bf16.msra.mxu0 %v1969_v22  ;;  %262 = vmatpush.bf16.msra.mxu2 %v1971_v23 }
  0x1d   :  { %250 = vmatpush.bf16.msra.mxu1 %v1981_v26  ;;  %276 = vmatpush.bf16.msra.mxu3 %v1983_v27 }
  0x1f   :  { %491 = vperm.xlu0 %1570, %v1486_v30  }
  0x20   :  { %238 = vmatpush.bf16.msra.mxu0 %v2005_v38  ;;  %263 = vmatpush.bf16.msra.mxu2 %v2010_v40 }
  0x21   :  { %251 = vmatpush.bf16.msra.mxu1 %v2014_v43  ;;  %277 = vmatpush.bf16.msra.mxu3 %v2016_v44 }
  0x23   :  { %239 = vmatmul.bf16.vlgmr.msra.gmra.mxu0 %v70_v49 }
  0x24   :  { %368 = vmatpush.bf16.msrb.mxu0 %v1746_v3  ;;  %252 = vmatmul.bf16.vlgmr.msra.gmra.mxu1 %v70_v49 }
  0x25   :  { %381 = vmatpush.bf16.msrb.mxu1 %v1757_v7  ;;  %407 = vmatpush.bf16.msrb.mxu3 %v1759_v8 }
  0x26   :  { %278 = vmatmul.bf16.vlgmr.msra.gmra.mxu3 %v70_v49  ;;  %264 = vmatpush.bf16.msra.mxu2 %v2028_v50 }
  0x28   :  { %369 = vmatpush.bf16.msrb.mxu0 %v1771_v12 }
  0x29   :  { %382 = vmatpush.bf16.msrb.mxu1 %v1784_v16  ;;  %408 = vmatpush.bf16.msrb.mxu3 %v1786_v17 }
  0x2a   :  { %394 = vmatpush.bf16.msrb.mxu2 %v1797_v21 }
  0x2b   :  { %265 = vmatmul.bf16.vlgmr.msra.gmra.mxu2 %v70_v49 }
  0x2c   :  { %370 = vmatpush.bf16.msrb.mxu0 %v1819_v28 }
  0x2d   :  { %383 = vmatpush.bf16.msrb.mxu1 %v1832_v32  ;;  %409 = vmatpush.bf16.msrb.mxu3 %v1834_v33 }
  0x2e   :  { %395 = vmatpush.bf16.msrb.mxu2 %v1836_v34 }
  0x30   :  { %371 = vmatpush.bf16.msrb.mxu0 %v1858_v41 }
  0x31   :  { %384 = vmatpush.bf16.msrb.mxu1 %v1870_v45  ;;  %410 = vmatpush.bf16.msrb.mxu3 %v1872_v46 }
  0x32   :  { %396 = vmatpush.bf16.msrb.mxu2 %v1860_v42 }
  0x34   :  { %372 = vmatpush.bf16.msrb.mxu0 %v1894_v53 }
  0x35   :  { %385 = vmatpush.bf16.msrb.mxu1 %v1906_v57  ;;  %411 = vmatpush.bf16.msrb.mxu3 %v1908_v58 }
  0x36   :  { %397 = vmatpush.bf16.msrb.mxu2 %v1896_v54 }
  0x38   :  { %373 = vmatpush.bf16.msrb.mxu0 %v1933_v2 }
  0x39   :  { %386 = vmatpush.bf16.msrb.mxu1 %v1948_v10  ;;  %412 = vmatpush.bf16.msrb.mxu3 %v1950_v11 }
  0x3a   :  { %398 = vmatpush.bf16.msrb.mxu2 %v1935_v4 }
  0x3c   :  { %374 = vmatpush.bf16.msrb.mxu0 %v1969_v22 }
  0x3d   :  { %387 = vmatpush.bf16.msrb.mxu1 %v1981_v26  ;;  %413 = vmatpush.bf16.msrb.mxu3 %v1983_v27 }
  0x3e   :  { %399 = vmatpush.bf16.msrb.mxu2 %v1971_v23 }
  0x40   :  { %375 = vmatpush.bf16.msrb.mxu0 %v2005_v38 }
  0x41   :  { %388 = vmatpush.bf16.msrb.mxu1 %v2014_v43  ;;  %414 = vmatpush.bf16.msrb.mxu3 %v2016_v44 }
  0x42   :  { %400 = vmatpush.bf16.msrb.mxu2 %v2010_v40 }
  0x44   :  { %508 = vmatpush.bf16.msra.mxu0 %v1746_v3 }
  0x45   :  { %521 = vmatpush.bf16.msra.mxu1 %v1757_v7  ;;  %547 = vmatpush.bf16.msra.mxu3 %v1759_v8 }
  0x46   :  { %401 = vmatpush.bf16.msrb.mxu2 %v2028_v50 }
  0x48   :  { %509 = vmatpush.bf16.msra.mxu0 %v1771_v12 }
  0x49   :  { %522 = vmatpush.bf16.msra.mxu1 %v1784_v16  ;;  %548 = vmatpush.bf16.msra.mxu3 %v1786_v17 }
  0x4a   :  { %534 = vmatpush.bf16.msra.mxu2 %v1797_v21 }
  0x4c   :  { %510 = vmatpush.bf16.msra.mxu0 %v1819_v28 }
  0x4d   :  { %523 = vmatpush.bf16.msra.mxu1 %v1832_v32  ;;  %549 = vmatpush.bf16.msra.mxu3 %v1834_v33 }
  0x4e   :  { %535 = vmatpush.bf16.msra.mxu2 %v1836_v34 }
  0x50   :  { %511 = vmatpush.bf16.msra.mxu0 %v1858_v41 }
  0x51   :  { %524 = vmatpush.bf16.msra.mxu1 %v1870_v45  ;;  %550 = vmatpush.bf16.msra.mxu3 %v1872_v46 }
  0x52   :  { %536 = vmatpush.bf16.msra.mxu2 %v1860_v42 }
  0x54   :  { %512 = vmatpush.bf16.msra.mxu0 %v1894_v53 }
  0x55   :  { %525 = vmatpush.bf16.msra.mxu1 %v1906_v57  ;;  %551 = vmatpush.bf16.msra.mxu3 %v1908_v58 }
  0x56   :  { %537 = vmatpush.bf16.msra.mxu2 %v1896_v54 }
  0x58   :  { %513 = vmatpush.bf16.msra.mxu0 %v1933_v2 }
  0x59   :  { %526 = vmatpush.bf16.msra.mxu1 %v1948_v10  ;;  %552 = vmatpush.bf16.msra.mxu3 %v1950_v11 }
  0x5a   :  { %538 = vmatpush.bf16.msra.mxu2 %v1935_v4 }
  0x5c   :  { %514 = vmatpush.bf16.msra.mxu0 %v1969_v22 }
  0x5d   :  { %527 = vmatpush.bf16.msra.mxu1 %v1981_v26  ;;  %553 = vmatpush.bf16.msra.mxu3 %v1983_v27 }
  0x5e   :  { %539 = vmatpush.bf16.msra.mxu2 %v1971_v23 }
  0x60   :  { %515 = vmatpush.bf16.msra.mxu0 %v2005_v38 }
  0x61   :  { %528 = vmatpush.bf16.msra.mxu1 %v2014_v43  ;;  %554 = vmatpush.bf16.msra.mxu3 %v2016_v44 }
  0x62   :  { %540 = vmatpush.bf16.msra.mxu2 %v2010_v40 }
  0x66   :  { %541 = vmatpush.bf16.msra.mxu2 %v2028_v50 }
  0xa0   :  { %v240_v56 = vpop.f32.mrf.mxu0 }
  0xa1   :  { %v283_v59 = vadd.f32 %v240_v56, %v66_v52  ;;  %v253_v60 = vpop.f32.mrf.mxu1 }
  0xa2   :  { %v284_v62 = vadd.f32 %v253_v60, %v67_v55 }
  0xa3   :  { %v1478_v63 = vmul.f32 -1.442695, %v283_v59 }
  0xa4   :  { %v1479_v0 = vmul.f32 -1.442695, %v284_v62 }
  0xa5   :  { %1573 = vpow2.f32 %v1478_v63 }
  0xa6   :  { %1575 = vpow2.f32 %v1479_v0 }
  0xa8   :  { %v242_v9 = vpop.f32.mrf.mxu0 }
  0xa9   :  { %v279_v5 = vpop.f32.mrf.mxu3  ;;  %v255_v13 = vpop.f32.mrf.mxu1 }
  0xaa   :  { %v286_v6 = vadd.f32 %v279_v5, %v69_v1 }
  0xab   :  { %v1574_v15 = vpop.eup %1573 }
  0xac   :  { %v1480_v14 = vmul.f32 -1.442695, %v286_v6  ;;  %v1576_v19 = vpop.eup %1575  ;;  %v290_v20 = vadd.f32 1.0, %v1574_v15 }
  0xad   :  { %v309_v24 = vadd.f32 1.0, %v1576_v19 }
  0xae   :  { %v266_v18 = vpop.f32.mrf.mxu2  ;;  %1577 = vpow2.f32 %v1480_v14  ;;  %v302_v55 = vand.u32 2147483648, %v290_v20  ;;  %v300_v59 = vand.u32 2147483647, %v290_v20  ;;  %vm296_vm2 = vweird.f32 %v290_v20  ;;  %v28_v14 = vld [vmem:[%s2414_s4] sm:$0xff] }
  0xaf   :  { %1579 = vrcp.f32 %v290_v20  ;;  %v285_v35 = vadd.f32 %v266_v18, %v68_v25  ;;  %v321_v60 = vand.u32 2147483648, %v309_v24  ;;  %v319_v62 = vand.u32 2147483647, %v309_v24 }
  0xb0   :  { %1581 = vrcp.f32 %v309_v24  ;;  %v303_v6 = vor.u32 1.1754944e-38, %v302_v55  ;;  %vm315_vm4 = vweird.f32 %v309_v24  ;;  %vm301_vm5 = vcmp.eq.f32.partialorder %v300_v59, 8.507059e+37 }
  0xb1   :  { %v281_v29 = vpop.f32.mrf.mxu3  ;;  %v322_v15 = vor.u32 1.1754944e-38, %v321_v60  ;;  %vm320_vm7 = vcmp.eq.f32.partialorder %v319_v62, 8.507059e+37 }
  0xb4   :  { %v1578_v31 = vpop.eup %1577 }
  0xb5   :  { %v329_v36 = vadd.f32 1.0, %v1578_v31  ;;  %v1580_v39 = vpop.eup %1579 }
  0xb6   :  { %v268_v37 = vpop.f32.mrf.mxu2  ;;  %v1582_v47 = vpop.eup %1581  ;;  %v292_v48 = vmul.f32 %v1580_v39, %v290_v20  ;;  %vm297_vm0 = vweird.f32 %v1580_v39 }
  0xb7   :  { %1583 = vrcp.f32 %v329_v36  ;;  %v311_v49 = vmul.f32 %v1582_v47, %v309_v24  ;;  %vm316_vm1 = vweird.f32 %v1582_v47  ;;  %vm298_vm3 = vmor %vm296_vm2, %vm297_vm0  ;;  %vm335_vm9 = vweird.f32 %v329_v36 }
  0xb8   :  { %1585 = vtanh.f32 %v285_v35  ;;  %v293_v51 = vsub.f32 1.0, %v292_v48  ;;  %vm317_vm6 = vmor %vm315_vm4, %vm316_vm1  ;;  %v354_v35 = vpop.permute.xlu0 %353 }
  0xb9   :  { %v312_v52 = vsub.f32 1.0, %v311_v49  ;;  %v339_v49 = vand.u32 2147483647, %v329_v36 }
  0xba   :  { %v294_v56 = vmul.f32 %v1580_v39, %v293_v51 }
  0xbb   :  { %v313_v61 = vmul.f32 %v1582_v47, %v312_v52  ;;  %vm340_vm11 = vcmp.eq.f32.partialorder %v339_v49, 8.507059e+37 }
  0xbc   :  { %v295_v0 = vadd.f32 %v1580_v39, %v294_v56 }
  0xbd   :  { %v1584_v63 = vpop.eup %1583  ;;  %v314_v9 = vadd.f32 %v1582_v47, %v313_v61 }
  0xbe   :  { %v1586_v1 = vpop.eup %1585  ;;  %v331_v5 = vmul.f32 %v1584_v63, %v329_v36  ;;  %v299_v13 = vsel %vm298_vm3, %v1580_v39, %v295_v0  ;;  %vm336_vm8 = vweird.f32 %v1584_v63  ;;  %v341_v39 = vand.u32 2147483648, %v329_v36  ;;  %v1481_v36 = vld [vmem:[%s2413_s0 + $0x10] sm:$0xff] }
  0xbf   :  { %v304_v18 = vsel %vm301_vm5, %v303_v6, %v299_v13  ;;  %v318_v19 = vsel %vm317_vm6, %v1582_v47, %v314_v9  ;;  %vm337_vm10 = vmor %vm335_vm9, %vm336_vm8  ;;  %v363_v61 = vunpack.c.l.bf16 %v1481_v36  ;;  %v364_v62 = vunpack.c.h.bf16 %v1481_v36  ;;  %v1482_v6 = vld [vmem:[%s2413_s0 + $0x18] sm:$0xff] }
  0xc0   :  { %v332_v25 = vsub.f32 1.0, %v331_v5  ;;  %v346_v29 = vmul.f32 %v1586_v1, %v304_v18  ;;  %v323_v20 = vsel %vm320_vm7, %v322_v15, %v318_v19  ;;  %v342_v51 = vor.u32 1.1754944e-38, %v341_v39 }
  0xc1   :  { %v345_v31 = vmul.f32 %v323_v20, %v28_v14  ;;  %v366_v14 = vunpack.c.h.bf16 %v1482_v6  ;;  %v365_v49 = vunpack.c.l.bf16 %v1482_v6 }
  0xc2   :  { %v333_v30 = vmul.f32 %v1584_v63, %v332_v25 }
  0xc3   :  { %v2107_v37 = vadd.f32 %v346_v29, %v345_v31 }
  0xc4   :  { %v334_v24 = vadd.f32 %v1584_v63, %v333_v30 }
  0xc5   :  { %1587 = vtanh.f32 %v2107_v37  ;;  %v358_v48 = vmul.f32 %v354_v35, %v2107_v37 }
  0xc6   :  { %v338_v47 = vsel %vm337_vm10, %v1584_v63, %v334_v24 }
  0xc7   :  { %359 = vst [vmem:[%s2415_s6] sm:$0xff] %v358_v48  ;;  %v343_v55 = vsel %vm340_vm11, %v342_v51, %v338_v47  ;;  %v1494_v47 = vld [vmem:[%s2411_s1 + $0x10] sm:$0xff] }
  0xc8   :  { %631 = vperm.xlu1 %1571, %v1494_v47  }
  0xcb   :  { %v1588_v52 = vpop.eup %1587 }
  0xcc   :  { %v349_v56 = vmul.f32 %v1588_v52, %v343_v55 }
  0xce   :  { %v356_v59 = vmul.f32 %v354_v35, %v349_v56  ;;  %v367_v60 = vpack.c.bf16 %v349_v56, %v349_v56 }
  0xd0   :  { %357 = vst [vmem:[%s2416_s5] sm:$0xff] %v356_v59  ;;  %376 = vmatmul.bf16.vlgmr.msrb.gmra.mxu0 %v367_v60  ;;  %389 = vmatmul.bf16.vlgmr.msrb.gmra.mxu1 %v367_v60 }
  0xd1   :  { %402 = vmatmul.bf16.vlgmr.msrb.gmra.mxu2 %v367_v60  ;;  %415 = vmatmul.bf16.vlgmr.msrb.gmra.mxu3 %v367_v60 }
  0xd2   :  { %648 = vmatpush.bf16.msrb.mxu0 %v1746_v3  ;;  %661 = vmatpush.bf16.msrb.mxu1 %v1757_v7 }
  0xd3   :  { %674 = vmatpush.bf16.msrb.mxu2 %v1797_v21  ;;  %687 = vmatpush.bf16.msrb.mxu3 %v1759_v8 }
  0xd6   :  { %649 = vmatpush.bf16.msrb.mxu0 %v1771_v12  ;;  %662 = vmatpush.bf16.msrb.mxu1 %v1784_v16 }
  0xd7   :  { %675 = vmatpush.bf16.msrb.mxu2 %v1836_v34  ;;  %688 = vmatpush.bf16.msrb.mxu3 %v1786_v17 }
  0xda   :  { %650 = vmatpush.bf16.msrb.mxu0 %v1819_v28  ;;  %663 = vmatpush.bf16.msrb.mxu1 %v1832_v32 }
  0xdb   :  { %676 = vmatpush.bf16.msrb.mxu2 %v1860_v42  ;;  %689 = vmatpush.bf16.msrb.mxu3 %v1834_v33 }
  0xde   :  { %651 = vmatpush.bf16.msrb.mxu0 %v1858_v41  ;;  %664 = vmatpush.bf16.msrb.mxu1 %v1870_v45 }
  0xdf   :  { %677 = vmatpush.bf16.msrb.mxu2 %v1896_v54  ;;  %690 = vmatpush.bf16.msrb.mxu3 %v1872_v46 }
  0xe2   :  { %652 = vmatpush.bf16.msrb.mxu0 %v1894_v53  ;;  %665 = vmatpush.bf16.msrb.mxu1 %v1906_v57 }
  0xe3   :  { %678 = vmatpush.bf16.msrb.mxu2 %v1935_v4  ;;  %691 = vmatpush.bf16.msrb.mxu3 %v1908_v58 }
  0xe6   :  { %653 = vmatpush.bf16.msrb.mxu0 %v1933_v2  ;;  %666 = vmatpush.bf16.msrb.mxu1 %v1948_v10 }
  0xe7   :  { %679 = vmatpush.bf16.msrb.mxu2 %v1971_v23  ;;  %692 = vmatpush.bf16.msrb.mxu3 %v1950_v11 }
  0xea   :  { %654 = vmatpush.bf16.msrb.mxu0 %v1969_v22  ;;  %667 = vmatpush.bf16.msrb.mxu1 %v1981_v26 }
  0xeb   :  { %680 = vmatpush.bf16.msrb.mxu2 %v2010_v40  ;;  %693 = vmatpush.bf16.msrb.mxu3 %v1983_v27 }
  0xee   :  { %655 = vmatpush.bf16.msrb.mxu0 %v2005_v38  ;;  %668 = vmatpush.bf16.msrb.mxu1 %v2014_v43 }
  0xef   :  { %681 = vmatpush.bf16.msrb.mxu2 %v2028_v50  ;;  %694 = vmatpush.bf16.msrb.mxu3 %v2016_v44 }
 0x14d   :  { %v377_v63 = vpop.f32.mrf.mxu0  ;;  %v390_v0 = vpop.f32.mrf.mxu1 }
 0x14e   :  { %v420_v1 = vadd.f32 %v377_v63, %v363_v61  ;;  %v421_v5 = vadd.f32 %v390_v0, %v364_v62 }
 0x150   :  { %v1483_v9 = vmul.f32 -1.442695, %v420_v1  ;;  %v1484_v13 = vmul.f32 -1.442695, %v421_v5 }
 0x152   :  { %1589 = vpow2.f32 %v1483_v9 }
 0x153   :  { %1591 = vpow2.f32 %v1484_v13 }
 0x154   :  { %v403_v15 = vpop.f32.mrf.mxu2  ;;  %v416_v18 = vpop.f32.mrf.mxu3 }
 0x155   :  { %v423_v19 = vadd.f32 %v416_v18, %v366_v14  ;;  %v379_v25 = vpop.f32.mrf.mxu0  ;;  %v392_v29 = vpop.f32.mrf.mxu1  ;;  %v422_v56 = vadd.f32 %v403_v15, %v365_v49 }
 0x157   :  { %v1485_v20 = vmul.f32 -1.442695, %v423_v19 }
 0x158   :  { %v1590_v30 = vpop.eup %1589 }
 0x159   :  { %v1592_v31 = vpop.eup %1591  ;;  %v427_v35 = vadd.f32 1.0, %v1590_v30  ;;  %1593 = vpow2.f32 %v1485_v20 }
 0x15a   :  { %v446_v24 = vadd.f32 1.0, %v1592_v31 }
 0x15b   :  { %1595 = vrcp.f32 %v427_v35  ;;  %v439_v63 = vand.u32 2147483648, %v427_v35  ;;  %v437_v1 = vand.u32 2147483647, %v427_v35  ;;  %vm433_vm14 = vweird.f32 %v427_v35 }
 0x15c   :  { %1597 = vrcp.f32 %v446_v24  ;;  %v405_v39 = vpop.f32.mrf.mxu2  ;;  %v418_v48 = vpop.f32.mrf.mxu3  ;;  %v458_v5 = vand.u32 2147483648, %v446_v24  ;;  %v456_v9 = vand.u32 2147483647, %v446_v24  ;;  %vm452_vm0 = vweird.f32 %v446_v24 }
 0x15d   :  { %v440_v15 = vor.u32 1.1754944e-38, %v439_v63  ;;  %vm438_vm1 = vcmp.eq.f32.partialorder %v437_v1, 8.507059e+37 }
 0x15e   :  { %v459_v29 = vor.u32 1.1754944e-38, %v458_v5  ;;  %vm457_vm3 = vcmp.eq.f32.partialorder %v456_v9, 8.507059e+37 }
 0x15f   :  { %v1594_v51 = vpop.eup %1593 }
 0x160   :  { %v466_v52 = vadd.f32 1.0, %v1594_v51 }
 0x161   :  { %v1596_v55 = vpop.eup %1595 }
 0x162   :  { %v1598_v59 = vpop.eup %1597  ;;  %v429_v60 = vmul.f32 %v1596_v55, %v427_v35  ;;  %1599 = vrcp.f32 %v466_v52  ;;  %vm434_vm12 = vweird.f32 %v1596_v55  ;;  %v492_v35 = vpop.permute.xlu0 %491  ;;  %vm472_vm5 = vweird.f32 %v466_v52 }
 0x163   :  { %v448_v36 = vmul.f32 %v1598_v59, %v446_v24  ;;  %1601 = vtanh.f32 %v422_v56  ;;  %vm453_vm13 = vweird.f32 %v1598_v59  ;;  %vm435_vm15 = vmor %vm433_vm14, %vm434_vm12  ;;  %v478_v24 = vand.u32 2147483648, %v466_v52 }
 0x164   :  { %v430_v61 = vsub.f32 1.0, %v429_v60  ;;  %vm454_vm2 = vmor %vm452_vm0, %vm453_vm13 }
 0x165   :  { %v449_v62 = vsub.f32 1.0, %v448_v36  ;;  %v476_v36 = vand.u32 2147483647, %v466_v52 }
 0x166   :  { %v431_v0 = vmul.f32 %v1596_v55, %v430_v61  ;;  %v479_v61 = vor.u32 1.1754944e-38, %v478_v24 }
 0x167   :  { %v450_v6 = vmul.f32 %v1598_v59, %v449_v62  ;;  %vm477_vm7 = vcmp.eq.f32.partialorder %v476_v36, 8.507059e+37 }
 0x168   :  { %v1600_v13 = vpop.eup %1599  ;;  %v432_v14 = vadd.f32 %v1596_v55, %v431_v0 }
 0x169   :  { %v468_v18 = vmul.f32 %v1600_v13, %v466_v52  ;;  %v451_v19 = vadd.f32 %v1598_v59, %v450_v6  ;;  %v1602_v20 = vpop.eup %1601  ;;  %vm473_vm4 = vweird.f32 %v1600_v13  ;;  %v1489_v52 = vld [vmem:[%s2413_s0 + $0x20] sm:$0xff] }
 0x16a   :  { %v436_v25 = vsel %vm435_vm15, %v1596_v55, %v432_v14  ;;  %vm474_vm6 = vmor %vm472_vm5, %vm473_vm4  ;;  %v503_v5 = vunpack.c.l.bf16 %v1489_v52  ;;  %v504_v6 = vunpack.c.h.bf16 %v1489_v52 }
 0x16b   :  { %v441_v30 = vsel %vm438_vm1, %v440_v15, %v436_v25  ;;  %v455_v31 = vsel %vm454_vm2, %v1598_v59, %v451_v19  ;;  %v469_v39 = vsub.f32 1.0, %v468_v18  ;;  %v1490_v18 = vld [vmem:[%s2413_s0 + $0x28] sm:$0xff] }
 0x16c   :  { %v483_v48 = vmul.f32 %v1602_v20, %v441_v30  ;;  %v460_v49 = vsel %vm457_vm3, %v459_v29, %v455_v31  ;;  %v506_v29 = vunpack.c.h.bf16 %v1490_v18  ;;  %v505_v36 = vunpack.c.l.bf16 %v1490_v18 }
 0x16d   :  { %v470_v47 = vmul.f32 %v1600_v13, %v469_v39  ;;  %v482_v51 = vmul.f32 %v460_v49, %v2107_v37 }
 0x16f   :  { %v2159_v56 = vadd.f32 %v483_v48, %v482_v51  ;;  %v471_v60 = vadd.f32 %v1600_v13, %v470_v47 }
 0x171   :  { %1603 = vtanh.f32 %v2159_v56  ;;  %v497_v55 = vmul.f32 %v492_v35, %v2159_v56  ;;  %v475_v59 = vsel %vm474_vm6, %v1600_v13, %v471_v60 }
 0x172   :  { %v480_v62 = vsel %vm477_vm7, %v479_v61, %v475_v59  ;;  %v1502_v59 = vld [vmem:[%s2411_s1 + $0x18] sm:$0xff] }
 0x173   :  { %1488 = vst [vmem:[%s2415_s6 + $0x8] sm:$0xff] %v497_v55  ;;  %771 = vperm.xlu1 %1571, %v1502_v59  }
 0x177   :  { %v1604_v37 = vpop.eup %1603 }
 0x178   :  { %v486_v63 = vmul.f32 %v1604_v37, %v480_v62 }
 0x17a   :  { %v494_v0 = vmul.f32 %v492_v35, %v486_v63  ;;  %v507_v1 = vpack.c.bf16 %v486_v63, %v486_v63 }
 0x17c   :  { %1487 = vst [vmem:[%s2416_s5 + $0x8] sm:$0xff] %v494_v0  ;;  %516 = vmatmul.bf16.vlgmr.msra.gmra.mxu0 %v507_v1  ;;  %529 = vmatmul.bf16.vlgmr.msra.gmra.mxu1 %v507_v1 }
 0x17d   :  { %542 = vmatmul.bf16.vlgmr.msra.gmra.mxu2 %v507_v1  ;;  %555 = vmatmul.bf16.vlgmr.msra.gmra.mxu3 %v507_v1 }
 0x17e   :  { %788 = vmatpush.bf16.msra.mxu0 %v1746_v3  ;;  %801 = vmatpush.bf16.msra.mxu1 %v1757_v7 }
 0x17f   :  { %814 = vmatpush.bf16.msra.mxu2 %v1797_v21  ;;  %827 = vmatpush.bf16.msra.mxu3 %v1759_v8 }
 0x182   :  { %789 = vmatpush.bf16.msra.mxu0 %v1771_v12  ;;  %802 = vmatpush.bf16.msra.mxu1 %v1784_v16 }
 0x183   :  { %815 = vmatpush.bf16.msra.mxu2 %v1836_v34  ;;  %828 = vmatpush.bf16.msra.mxu3 %v1786_v17 }
 0x186   :  { %790 = vmatpush.bf16.msra.mxu0 %v1819_v28  ;;  %803 = vmatpush.bf16.msra.mxu1 %v1832_v32 }
 0x187   :  { %816 = vmatpush.bf16.msra.mxu2 %v1860_v42  ;;  %829 = vmatpush.bf16.msra.mxu3 %v1834_v33 }
 0x18a   :  { %791 = vmatpush.bf16.msra.mxu0 %v1858_v41  ;;  %804 = vmatpush.bf16.msra.mxu1 %v1870_v45 }
 0x18b   :  { %817 = vmatpush.bf16.msra.mxu2 %v1896_v54  ;;  %830 = vmatpush.bf16.msra.mxu3 %v1872_v46 }
 0x18e   :  { %792 = vmatpush.bf16.msra.mxu0 %v1894_v53  ;;  %805 = vmatpush.bf16.msra.mxu1 %v1906_v57 }
 0x18f   :  { %818 = vmatpush.bf16.msra.mxu2 %v1935_v4  ;;  %831 = vmatpush.bf16.msra.mxu3 %v1908_v58 }
 0x192   :  { %793 = vmatpush.bf16.msra.mxu0 %v1933_v2  ;;  %806 = vmatpush.bf16.msra.mxu1 %v1948_v10 }
 0x193   :  { %819 = vmatpush.bf16.msra.mxu2 %v1971_v23  ;;  %832 = vmatpush.bf16.msra.mxu3 %v1950_v11 }
 0x196   :  { %794 = vmatpush.bf16.msra.mxu0 %v1969_v22  ;;  %807 = vmatpush.bf16.msra.mxu1 %v1981_v26 }
 0x197   :  { %820 = vmatpush.bf16.msra.mxu2 %v2010_v40  ;;  %833 = vmatpush.bf16.msra.mxu3 %v1983_v27 }
 0x19a   :  { %795 = vmatpush.bf16.msra.mxu0 %v2005_v38  ;;  %808 = vmatpush.bf16.msra.mxu1 %v2014_v43 }
 0x19b   :  { %821 = vmatpush.bf16.msra.mxu2 %v2028_v50  ;;  %834 = vmatpush.bf16.msra.mxu3 %v2016_v44 }
 0x1f9   :  { %v517_v9 = vpop.f32.mrf.mxu0  ;;  %v530_v13 = vpop.f32.mrf.mxu1 }
 0x1fa   :  { %v560_v14 = vadd.f32 %v517_v9, %v503_v5  ;;  %v561_v15 = vadd.f32 %v530_v13, %v504_v6 }
 0x1fc   :  { %v1491_v19 = vmul.f32 -1.442695, %v560_v14  ;;  %v1492_v25 = vmul.f32 -1.442695, %v561_v15 }
 0x1fe   :  { %1605 = vpow2.f32 %v1491_v19 }
 0x1ff   :  { %1607 = vpow2.f32 %v1492_v25 }
 0x200   :  { %v543_v20 = vpop.f32.mrf.mxu2  ;;  %v556_v30 = vpop.f32.mrf.mxu3 }
 0x201   :  { %v563_v31 = vadd.f32 %v556_v30, %v506_v29  ;;  %v519_v39 = vpop.f32.mrf.mxu0  ;;  %v532_v48 = vpop.f32.mrf.mxu1  ;;  %v562_v63 = vadd.f32 %v543_v20, %v505_v36 }
 0x203   :  { %v1493_v49 = vmul.f32 -1.442695, %v563_v31 }
 0x204   :  { %v1606_v47 = vpop.eup %1605 }
 0x205   :  { %v1608_v51 = vpop.eup %1607  ;;  %v567_v35 = vadd.f32 1.0, %v1606_v47  ;;  %1609 = vpow2.f32 %v1493_v49 }
 0x206   :  { %v586_v60 = vadd.f32 1.0, %v1608_v51 }
 0x207   :  { %1611 = vrcp.f32 %v567_v35  ;;  %v579_v9 = vand.u32 2147483648, %v567_v35  ;;  %v577_v14 = vand.u32 2147483647, %v567_v35  ;;  %vm573_vm10 = vweird.f32 %v567_v35 }
 0x208   :  { %1613 = vrcp.f32 %v586_v60  ;;  %v545_v24 = vpop.f32.mrf.mxu2  ;;  %v558_v55 = vpop.f32.mrf.mxu3  ;;  %v598_v15 = vand.u32 2147483648, %v586_v60  ;;  %v596_v19 = vand.u32 2147483647, %v586_v60  ;;  %vm592_vm12 = vweird.f32 %v586_v60 }
 0x209   :  { %v580_v20 = vor.u32 1.1754944e-38, %v579_v9  ;;  %vm578_vm13 = vcmp.eq.f32.partialorder %v577_v14, 8.507059e+37 }
 0x20a   :  { %v599_v48 = vor.u32 1.1754944e-38, %v598_v15  ;;  %vm597_vm15 = vcmp.eq.f32.partialorder %v596_v19, 8.507059e+37 }
 0x20b   :  { %v1610_v61 = vpop.eup %1609 }
 0x20c   :  { %v606_v37 = vadd.f32 1.0, %v1610_v61 }
 0x20d   :  { %v1612_v62 = vpop.eup %1611 }
 0x20e   :  { %v1614_v0 = vpop.eup %1613  ;;  %v569_v1 = vmul.f32 %v1612_v62, %v567_v35  ;;  %1615 = vrcp.f32 %v606_v37  ;;  %vm574_vm8 = vweird.f32 %v1612_v62  ;;  %v632_v35 = vpop.permute.xlu1 %631  ;;  %vm612_vm1 = vweird.f32 %v606_v37 }
 0x20f   :  { %v588_v52 = vmul.f32 %v1614_v0, %v586_v60  ;;  %1617 = vtanh.f32 %v562_v63  ;;  %vm593_vm9 = vweird.f32 %v1614_v0  ;;  %vm575_vm11 = vmor %vm573_vm10, %vm574_vm8  ;;  %v618_v60 = vand.u32 2147483648, %v606_v37 }
 0x210   :  { %v570_v5 = vsub.f32 1.0, %v569_v1  ;;  %vm594_vm14 = vmor %vm592_vm12, %vm593_vm9 }
 0x211   :  { %v589_v6 = vsub.f32 1.0, %v588_v52  ;;  %v616_v52 = vand.u32 2147483647, %v606_v37 }
 0x212   :  { %v571_v13 = vmul.f32 %v1612_v62, %v570_v5  ;;  %v619_v5 = vor.u32 1.1754944e-38, %v618_v60 }
 0x213   :  { %v590_v18 = vmul.f32 %v1614_v0, %v589_v6  ;;  %vm617_vm3 = vcmp.eq.f32.partialorder %v616_v52, 8.507059e+37 }
 0x214   :  { %v1616_v25 = vpop.eup %1615  ;;  %v572_v29 = vadd.f32 %v1612_v62, %v571_v13 }
 0x215   :  { %v608_v30 = vmul.f32 %v1616_v25, %v606_v37  ;;  %v591_v31 = vadd.f32 %v1614_v0, %v590_v18  ;;  %v1618_v49 = vpop.eup %1617  ;;  %vm613_vm0 = vweird.f32 %v1616_v25  ;;  %v1497_v37 = vld [vmem:[%s2413_s0 + $0x30] sm:$0xff] }
 0x216   :  { %v576_v39 = vsel %vm575_vm11, %v1612_v62, %v572_v29  ;;  %vm614_vm2 = vmor %vm612_vm1, %vm613_vm0  ;;  %v643_v15 = vunpack.c.l.bf16 %v1497_v37  ;;  %v644_v18 = vunpack.c.h.bf16 %v1497_v37 }
 0x217   :  { %v581_v47 = vsel %vm578_vm13, %v580_v20, %v576_v39  ;;  %v595_v51 = vsel %vm594_vm14, %v1614_v0, %v591_v31  ;;  %v609_v24 = vsub.f32 1.0, %v608_v30  ;;  %v1498_v30 = vld [vmem:[%s2413_s0 + $0x38] sm:$0xff] }
 0x218   :  { %v623_v55 = vmul.f32 %v1618_v49, %v581_v47  ;;  %v600_v36 = vsel %vm597_vm15, %v599_v48, %v595_v51  ;;  %v646_v48 = vunpack.c.h.bf16 %v1498_v30  ;;  %v645_v52 = vunpack.c.l.bf16 %v1498_v30 }
 0x219   :  { %v610_v59 = vmul.f32 %v1616_v25, %v609_v24  ;;  %v622_v61 = vmul.f32 %v600_v36, %v2159_v56 }
 0x21b   :  { %v2211_v63 = vadd.f32 %v623_v55, %v622_v61  ;;  %v611_v1 = vadd.f32 %v1616_v25, %v610_v59 }
 0x21d   :  { %1619 = vtanh.f32 %v2211_v63  ;;  %v637_v62 = vmul.f32 %v632_v35, %v2211_v63  ;;  %v615_v0 = vsel %vm614_vm2, %v1616_v25, %v611_v1 }
 0x21e   :  { %v620_v6 = vsel %vm617_vm3, %v619_v5, %v615_v0  ;;  %v1510_v0 = vld [vmem:[%s2411_s1 + $0x20] sm:$0xff] }
 0x21f   :  { %1496 = vst [vmem:[%s2415_s6 + $0x10] sm:$0xff] %v637_v62  ;;  %911 = vperm.xlu2 %1572, %v1510_v0  }
 0x223   :  { %v1620_v56 = vpop.eup %1619 }
 0x224   :  { %v626_v9 = vmul.f32 %v1620_v56, %v620_v6 }
 0x226   :  { %v634_v13 = vmul.f32 %v632_v35, %v626_v9  ;;  %v647_v14 = vpack.c.bf16 %v626_v9, %v626_v9 }
 0x228   :  { %1495 = vst [vmem:[%s2416_s5 + $0x10] sm:$0xff] %v634_v13  ;;  %656 = vmatmul.bf16.vlgmr.msrb.gmra.mxu0 %v647_v14  ;;  %669 = vmatmul.bf16.vlgmr.msrb.gmra.mxu1 %v647_v14 }
 0x229   :  { %682 = vmatmul.bf16.vlgmr.msrb.gmra.mxu2 %v647_v14  ;;  %695 = vmatmul.bf16.vlgmr.msrb.gmra.mxu3 %v647_v14 }
 0x22a   :  { %928 = vmatpush.bf16.msrb.mxu0 %v1746_v3  ;;  %941 = vmatpush.bf16.msrb.mxu1 %v1757_v7 }
 0x22b   :  { %954 = vmatpush.bf16.msrb.mxu2 %v1797_v21  ;;  %967 = vmatpush.bf16.msrb.mxu3 %v1759_v8 }
 0x22e   :  { %929 = vmatpush.bf16.msrb.mxu0 %v1771_v12  ;;  %942 = vmatpush.bf16.msrb.mxu1 %v1784_v16 }
 0x22f   :  { %955 = vmatpush.bf16.msrb.mxu2 %v1836_v34  ;;  %968 = vmatpush.bf16.msrb.mxu3 %v1786_v17 }
 0x232   :  { %930 = vmatpush.bf16.msrb.mxu0 %v1819_v28  ;;  %943 = vmatpush.bf16.msrb.mxu1 %v1832_v32 }
 0x233   :  { %956 = vmatpush.bf16.msrb.mxu2 %v1860_v42  ;;  %969 = vmatpush.bf16.msrb.mxu3 %v1834_v33 }
 0x236   :  { %931 = vmatpush.bf16.msrb.mxu0 %v1858_v41  ;;  %944 = vmatpush.bf16.msrb.mxu1 %v1870_v45 }
 0x237   :  { %957 = vmatpush.bf16.msrb.mxu2 %v1896_v54  ;;  %970 = vmatpush.bf16.msrb.mxu3 %v1872_v46 }
 0x23a   :  { %932 = vmatpush.bf16.msrb.mxu0 %v1894_v53  ;;  %945 = vmatpush.bf16.msrb.mxu1 %v1906_v57 }
 0x23b   :  { %958 = vmatpush.bf16.msrb.mxu2 %v1935_v4  ;;  %971 = vmatpush.bf16.msrb.mxu3 %v1908_v58 }
 0x23e   :  { %933 = vmatpush.bf16.msrb.mxu0 %v1933_v2  ;;  %946 = vmatpush.bf16.msrb.mxu1 %v1948_v10 }
 0x23f   :  { %959 = vmatpush.bf16.msrb.mxu2 %v1971_v23  ;;  %972 = vmatpush.bf16.msrb.mxu3 %v1950_v11 }
 0x242   :  { %934 = vmatpush.bf16.msrb.mxu0 %v1969_v22  ;;  %947 = vmatpush.bf16.msrb.mxu1 %v1981_v26 }
 0x243   :  { %960 = vmatpush.bf16.msrb.mxu2 %v2010_v40  ;;  %973 = vmatpush.bf16.msrb.mxu3 %v1983_v27 }
 0x246   :  { %935 = vmatpush.bf16.msrb.mxu0 %v2005_v38  ;;  %948 = vmatpush.bf16.msrb.mxu1 %v2014_v43 }
 0x247   :  { %961 = vmatpush.bf16.msrb.mxu2 %v2028_v50  ;;  %974 = vmatpush.bf16.msrb.mxu3 %v2016_v44 }
 0x2a5   :  { %v657_v19 = vpop.f32.mrf.mxu0  ;;  %v670_v25 = vpop.f32.mrf.mxu1 }
 0x2a6   :  { %v700_v29 = vadd.f32 %v657_v19, %v643_v15  ;;  %v701_v20 = vadd.f32 %v670_v25, %v644_v18 }
 0x2a8   :  { %v1499_v31 = vmul.f32 -1.442695, %v700_v29  ;;  %v1500_v39 = vmul.f32 -1.442695, %v701_v20 }
 0x2aa   :  { %1621 = vpow2.f32 %v1499_v31 }
 0x2ab   :  { %1623 = vpow2.f32 %v1500_v39 }
 0x2ac   :  { %v683_v49 = vpop.f32.mrf.mxu2  ;;  %v696_v47 = vpop.f32.mrf.mxu3 }
 0x2ad   :  { %v703_v51 = vadd.f32 %v696_v47, %v646_v48  ;;  %v659_v24 = vpop.f32.mrf.mxu0  ;;  %v672_v55 = vpop.f32.mrf.mxu1  ;;  %v702_v9 = vadd.f32 %v683_v49, %v645_v52 }
 0x2af   :  { %v1501_v36 = vmul.f32 -1.442695, %v703_v51 }
 0x2b0   :  { %v1622_v59 = vpop.eup %1621 }
 0x2b1   :  { %v1624_v61 = vpop.eup %1623  ;;  %v707_v35 = vadd.f32 1.0, %v1622_v59  ;;  %1625 = vpow2.f32 %v1501_v36 }
 0x2b2   :  { %v726_v1 = vadd.f32 1.0, %v1624_v61 }
 0x2b3   :  { %1627 = vrcp.f32 %v707_v35  ;;  %v719_v19 = vand.u32 2147483648, %v707_v35  ;;  %v717_v29 = vand.u32 2147483647, %v707_v35  ;;  %vm713_vm6 = vweird.f32 %v707_v35 }
 0x2b4   :  { %1629 = vrcp.f32 %v726_v1  ;;  %v685_v60 = vpop.f32.mrf.mxu2  ;;  %v698_v62 = vpop.f32.mrf.mxu3  ;;  %v738_v20 = vand.u32 2147483648, %v726_v1  ;;  %v736_v31 = vand.u32 2147483647, %v726_v1  ;;  %vm732_vm8 = vweird.f32 %v726_v1 }
 0x2b5   :  { %v720_v49 = vor.u32 1.1754944e-38, %v719_v19  ;;  %vm718_vm9 = vcmp.eq.f32.partialorder %v717_v29, 8.507059e+37 }
 0x2b6   :  { %v739_v55 = vor.u32 1.1754944e-38, %v738_v20  ;;  %vm737_vm11 = vcmp.eq.f32.partialorder %v736_v31, 8.507059e+37 }
 0x2b7   :  { %v1626_v5 = vpop.eup %1625 }
 0x2b8   :  { %v746_v56 = vadd.f32 1.0, %v1626_v5 }
 0x2b9   :  { %v1628_v6 = vpop.eup %1627 }
 0x2ba   :  { %v1630_v13 = vpop.eup %1629  ;;  %v709_v14 = vmul.f32 %v1628_v6, %v707_v35  ;;  %1631 = vrcp.f32 %v746_v56  ;;  %vm714_vm4 = vweird.f32 %v1628_v6  ;;  %v772_v35 = vpop.permute.xlu1 %771  ;;  %vm752_vm13 = vweird.f32 %v746_v56 }
 0x2bb   :  { %v728_v37 = vmul.f32 %v1630_v13, %v726_v1  ;;  %1633 = vtanh.f32 %v702_v9  ;;  %vm733_vm5 = vweird.f32 %v1630_v13  ;;  %vm715_vm7 = vmor %vm713_vm6, %vm714_vm4  ;;  %v758_v1 = vand.u32 2147483648, %v746_v56 }
 0x2bc   :  { %v710_v15 = vsub.f32 1.0, %v709_v14  ;;  %vm734_vm10 = vmor %vm732_vm8, %vm733_vm5 }
 0x2bd   :  { %v729_v18 = vsub.f32 1.0, %v728_v37  ;;  %v756_v37 = vand.u32 2147483647, %v746_v56 }
 0x2be   :  { %v711_v25 = vmul.f32 %v1628_v6, %v710_v15  ;;  %v759_v15 = vor.u32 1.1754944e-38, %v758_v1 }
 0x2bf   :  { %v730_v30 = vmul.f32 %v1630_v13, %v729_v18  ;;  %vm757_vm15 = vcmp.eq.f32.partialorder %v756_v37, 8.507059e+37 }
 0x2c0   :  { %v1632_v39 = vpop.eup %1631  ;;  %v712_v48 = vadd.f32 %v1628_v6, %v711_v25 }
 0x2c1   :  { %v748_v47 = vmul.f32 %v1632_v39, %v746_v56  ;;  %v731_v51 = vadd.f32 %v1630_v13, %v730_v30  ;;  %v1634_v36 = vpop.eup %1633  ;;  %vm753_vm12 = vweird.f32 %v1632_v39  ;;  %v1505_v56 = vld [vmem:[%s2413_s0 + $0x40] sm:$0xff] }
 0x2c2   :  { %v716_v24 = vsel %vm715_vm7, %v1628_v6, %v712_v48  ;;  %vm754_vm14 = vmor %vm752_vm13, %vm753_vm12  ;;  %v783_v20 = vunpack.c.l.bf16 %v1505_v56  ;;  %v784_v30 = vunpack.c.h.bf16 %v1505_v56 }
 0x2c3   :  { %v721_v59 = vsel %vm718_vm9, %v720_v49, %v716_v24  ;;  %v735_v61 = vsel %vm734_vm10, %v1630_v13, %v731_v51  ;;  %v749_v60 = vsub.f32 1.0, %v748_v47  ;;  %v1506_v47 = vld [vmem:[%s2413_s0 + $0x48] sm:$0xff] }
 0x2c4   :  { %v763_v62 = vmul.f32 %v1634_v36, %v721_v59  ;;  %v740_v52 = vsel %vm737_vm11, %v739_v55, %v735_v61  ;;  %v786_v55 = vunpack.c.h.bf16 %v1506_v47  ;;  %v785_v37 = vunpack.c.l.bf16 %v1506_v47 }
 0x2c5   :  { %v750_v0 = vmul.f32 %v1632_v39, %v749_v60  ;;  %v762_v5 = vmul.f32 %v740_v52, %v2211_v63 }
 0x2c7   :  { %v2263_v9 = vadd.f32 %v763_v62, %v762_v5  ;;  %v751_v14 = vadd.f32 %v1632_v39, %v750_v0 }
 0x2c9   :  { %1635 = vtanh.f32 %v2263_v9  ;;  %v777_v6 = vmul.f32 %v772_v35, %v2263_v9  ;;  %v755_v13 = vsel %vm754_vm14, %v1632_v39, %v751_v14 }
 0x2ca   :  { %v760_v18 = vsel %vm757_vm15, %v759_v15, %v755_v13  ;;  %v1518_v13 = vld [vmem:[%s2411_s1 + $0x28] sm:$0xff] }
 0x2cb   :  { %1504 = vst [vmem:[%s2415_s6 + $0x18] sm:$0xff] %v777_v6  ;;  %1051 = vperm.xlu2 %1572, %v1518_v13  }
 0x2cf   :  { %v1636_v63 = vpop.eup %1635 }
 0x2d0   :  { %v766_v19 = vmul.f32 %v1636_v63, %v760_v18 }
 0x2d2   :  { %v774_v25 = vmul.f32 %v772_v35, %v766_v19  ;;  %v787_v29 = vpack.c.bf16 %v766_v19, %v766_v19 }
 0x2d4   :  { %1503 = vst [vmem:[%s2416_s5 + $0x18] sm:$0xff] %v774_v25  ;;  %796 = vmatmul.bf16.vlgmr.msra.gmra.mxu0 %v787_v29  ;;  %809 = vmatmul.bf16.vlgmr.msra.gmra.mxu1 %v787_v29 }
 0x2d5   :  { %822 = vmatmul.bf16.vlgmr.msra.gmra.mxu2 %v787_v29  ;;  %835 = vmatmul.bf16.vlgmr.msra.gmra.mxu3 %v787_v29 }
 0x2d6   :  { %1068 = vmatpush.bf16.msra.mxu0 %v1746_v3  ;;  %1081 = vmatpush.bf16.msra.mxu1 %v1757_v7 }
 0x2d7   :  { %1094 = vmatpush.bf16.msra.mxu2 %v1797_v21  ;;  %1107 = vmatpush.bf16.msra.mxu3 %v1759_v8 }
 0x2da   :  { %1069 = vmatpush.bf16.msra.mxu0 %v1771_v12  ;;  %1082 = vmatpush.bf16.msra.mxu1 %v1784_v16 }
 0x2db   :  { %1095 = vmatpush.bf16.msra.mxu2 %v1836_v34  ;;  %1108 = vmatpush.bf16.msra.mxu3 %v1786_v17 }
 0x2de   :  { %1070 = vmatpush.bf16.msra.mxu0 %v1819_v28  ;;  %1083 = vmatpush.bf16.msra.mxu1 %v1832_v32 }
 0x2df   :  { %1096 = vmatpush.bf16.msra.mxu2 %v1860_v42  ;;  %1109 = vmatpush.bf16.msra.mxu3 %v1834_v33 }
 0x2e2   :  { %1071 = vmatpush.bf16.msra.mxu0 %v1858_v41  ;;  %1084 = vmatpush.bf16.msra.mxu1 %v1870_v45 }
 0x2e3   :  { %1097 = vmatpush.bf16.msra.mxu2 %v1896_v54  ;;  %1110 = vmatpush.bf16.msra.mxu3 %v1872_v46 }
 0x2e6   :  { %1072 = vmatpush.bf16.msra.mxu0 %v1894_v53  ;;  %1085 = vmatpush.bf16.msra.mxu1 %v1906_v57 }
 0x2e7   :  { %1098 = vmatpush.bf16.msra.mxu2 %v1935_v4  ;;  %1111 = vmatpush.bf16.msra.mxu3 %v1908_v58 }
 0x2ea   :  { %1073 = vmatpush.bf16.msra.mxu0 %v1933_v2  ;;  %1086 = vmatpush.bf16.msra.mxu1 %v1948_v10 }
 0x2eb   :  { %1099 = vmatpush.bf16.msra.mxu2 %v1971_v23  ;;  %1112 = vmatpush.bf16.msra.mxu3 %v1950_v11 }
 0x2ee   :  { %1074 = vmatpush.bf16.msra.mxu0 %v1969_v22  ;;  %1087 = vmatpush.bf16.msra.mxu1 %v1981_v26 }
 0x2ef   :  { %1100 = vmatpush.bf16.msra.mxu2 %v2010_v40  ;;  %1113 = vmatpush.bf16.msra.mxu3 %v1983_v27 }
 0x2f2   :  { %1075 = vmatpush.bf16.msra.mxu0 %v2005_v38  ;;  %1088 = vmatpush.bf16.msra.mxu1 %v2014_v43 }
 0x2f3   :  { %1101 = vmatpush.bf16.msra.mxu2 %v2028_v50  ;;  %1114 = vmatpush.bf16.msra.mxu3 %v2016_v44 }
 0x351   :  { %v797_v31 = vpop.f32.mrf.mxu0  ;;  %v810_v39 = vpop.f32.mrf.mxu1 }
 0x352   :  { %v840_v48 = vadd.f32 %v797_v31, %v783_v20  ;;  %v841_v49 = vadd.f32 %v810_v39, %v784_v30 }
 0x354   :  { %v1507_v51 = vmul.f32 -1.442695, %v840_v48  ;;  %v1508_v24 = vmul.f32 -1.442695, %v841_v49 }
 0x356   :  { %1637 = vpow2.f32 %v1507_v51 }
 0x357   :  { %1639 = vpow2.f32 %v1508_v24 }
 0x358   :  { %v823_v36 = vpop.f32.mrf.mxu2  ;;  %v836_v59 = vpop.f32.mrf.mxu3 }
 0x359   :  { %v843_v61 = vadd.f32 %v836_v59, %v786_v55  ;;  %v799_v60 = vpop.f32.mrf.mxu0  ;;  %v812_v62 = vpop.f32.mrf.mxu1  ;;  %v842_v19 = vadd.f32 %v823_v36, %v785_v37 }
 0x35b   :  { %v1509_v52 = vmul.f32 -1.442695, %v843_v61 }
 0x35c   :  { %v1638_v0 = vpop.eup %1637 }
 0x35d   :  { %v1640_v5 = vpop.eup %1639  ;;  %v847_v35 = vadd.f32 1.0, %v1638_v0  ;;  %1641 = vpow2.f32 %v1509_v52 }
 0x35e   :  { %v866_v14 = vadd.f32 1.0, %v1640_v5 }
 0x35f   :  { %1643 = vrcp.f32 %v847_v35  ;;  %v859_v31 = vand.u32 2147483648, %v847_v35  ;;  %v857_v48 = vand.u32 2147483647, %v847_v35  ;;  %vm853_vm2 = vweird.f32 %v847_v35 }
 0x360   :  { %1645 = vrcp.f32 %v866_v14  ;;  %v825_v1 = vpop.f32.mrf.mxu2  ;;  %v838_v6 = vpop.f32.mrf.mxu3  ;;  %v878_v49 = vand.u32 2147483648, %v866_v14  ;;  %v876_v51 = vand.u32 2147483647, %v866_v14  ;;  %vm872_vm4 = vweird.f32 %v866_v14 }
 0x361   :  { %v860_v36 = vor.u32 1.1754944e-38, %v859_v31  ;;  %vm858_vm5 = vcmp.eq.f32.partialorder %v857_v48, 8.507059e+37 }
 0x362   :  { %v879_v62 = vor.u32 1.1754944e-38, %v878_v49  ;;  %vm877_vm7 = vcmp.eq.f32.partialorder %v876_v51, 8.507059e+37 }
 0x363   :  { %v1642_v15 = vpop.eup %1641 }
 0x364   :  { %v886_v63 = vadd.f32 1.0, %v1642_v15 }
 0x365   :  { %v1644_v18 = vpop.eup %1643 }
 0x366   :  { %v1646_v25 = vpop.eup %1645  ;;  %v849_v29 = vmul.f32 %v1644_v18, %v847_v35  ;;  %1647 = vrcp.f32 %v886_v63  ;;  %vm854_vm0 = vweird.f32 %v1644_v18  ;;  %v912_v35 = vpop.permute.xlu2 %911  ;;  %vm892_vm9 = vweird.f32 %v886_v63 }
 0x367   :  { %v868_v56 = vmul.f32 %v1646_v25, %v866_v14  ;;  %1649 = vtanh.f32 %v842_v19  ;;  %vm873_vm1 = vweird.f32 %v1646_v25  ;;  %vm855_vm3 = vmor %vm853_vm2, %vm854_vm0  ;;  %v898_v14 = vand.u32 2147483648, %v886_v63 }
 0x368   :  { %v850_v20 = vsub.f32 1.0, %v849_v29  ;;  %vm874_vm6 = vmor %vm872_vm4, %vm873_vm1 }
 0x369   :  { %v869_v30 = vsub.f32 1.0, %v868_v56  ;;  %v896_v56 = vand.u32 2147483647, %v886_v63 }
 0x36a   :  { %v851_v39 = vmul.f32 %v1644_v18, %v850_v20  ;;  %v899_v20 = vor.u32 1.1754944e-38, %v898_v14 }
 0x36b   :  { %v870_v47 = vmul.f32 %v1646_v25, %v869_v30  ;;  %vm897_vm11 = vcmp.eq.f32.partialorder %v896_v56, 8.507059e+37 }
 0x36c   :  { %v1648_v24 = vpop.eup %1647  ;;  %v852_v55 = vadd.f32 %v1644_v18, %v851_v39 }
 0x36d   :  { %v888_v59 = vmul.f32 %v1648_v24, %v886_v63  ;;  %v871_v61 = vadd.f32 %v1646_v25, %v870_v47  ;;  %v1650_v52 = vpop.eup %1649  ;;  %vm893_vm8 = vweird.f32 %v1648_v24 }
 0x36e   :  { %v856_v60 = vsel %vm855_vm3, %v1644_v18, %v852_v55  ;;  %vm894_vm10 = vmor %vm892_vm9, %vm893_vm8  ;;  %v1052_v56 = vpop.permute.xlu2 %1051 }
 0x36f   :  { %v861_v0 = vsel %vm858_vm5, %v860_v36, %v856_v60  ;;  %v875_v5 = vsel %vm874_vm6, %v1646_v25, %v871_v61  ;;  %v889_v1 = vsub.f32 1.0, %v888_v59 }
 0x370   :  { %v903_v6 = vmul.f32 %v1650_v52, %v861_v0  ;;  %v880_v37 = vsel %vm877_vm7, %v879_v62, %v875_v5 }
 0x371   :  { %v890_v13 = vmul.f32 %v1648_v24, %v889_v1  ;;  %v902_v15 = vmul.f32 %v880_v37, %v2263_v9 }
 0x373   :  { %v2315_v19 = vadd.f32 %v903_v6, %v902_v15  ;;  %v891_v29 = vadd.f32 %v1648_v24, %v890_v13 }
 0x375   :  { %1651 = vtanh.f32 %v2315_v19  ;;  %v917_v18 = vmul.f32 %v912_v35, %v2315_v19  ;;  %v895_v25 = vsel %vm894_vm10, %v1648_v24, %v891_v29 }
 0x376   :  { %v900_v30 = vsel %vm897_vm11, %v899_v20, %v895_v25 }
 0x377   :  { %1512 = vst [vmem:[%s2415_s6 + $0x20] sm:$0xff] %v917_v18 }
 0x37b   :  { %v1652_v9 = vpop.eup %1651 }
 0x37c   :  { %v906_v31 = vmul.f32 %v1652_v9, %v900_v30 }
 0x37e   :  { %v914_v39 = vmul.f32 %v912_v35, %v906_v31  ;;  %v927_v48 = vpack.c.bf16 %v906_v31, %v906_v31 }
 0x380   :  { %1511 = vst [vmem:[%s2416_s5 + $0x20] sm:$0xff] %v914_v39  ;;  %936 = vmatmul.bf16.vlgmr.msrb.gmra.mxu0 %v927_v48  ;;  %949 = vmatmul.bf16.vlgmr.msrb.gmra.mxu1 %v927_v48 }
 0x381   :  { %962 = vmatmul.bf16.vlgmr.msrb.gmra.mxu2 %v927_v48  ;;  %975 = vmatmul.bf16.vlgmr.msrb.gmra.mxu3 %v927_v48 }
 0x382   :  { %1208 = vmatpush.bf16.msrb.mxu0 %v1746_v3  ;;  %1221 = vmatpush.bf16.msrb.mxu1 %v1757_v7  ;;  %v1513_v3 = vld [vmem:[%s2413_s0 + $0x50] sm:$0xff] }
 0x383   :  { %1234 = vmatpush.bf16.msrb.mxu2 %v1797_v21  ;;  %1247 = vmatpush.bf16.msrb.mxu3 %v1759_v8  ;;  %v923_v7 = vunpack.c.l.bf16 %v1513_v3  ;;  %v924_v8 = vunpack.c.h.bf16 %v1513_v3 }
 0x386   :  { %1209 = vmatpush.bf16.msrb.mxu0 %v1771_v12  ;;  %1222 = vmatpush.bf16.msrb.mxu1 %v1784_v16 }
 0x387   :  { %1235 = vmatpush.bf16.msrb.mxu2 %v1836_v34  ;;  %1248 = vmatpush.bf16.msrb.mxu3 %v1786_v17 }
 0x38a   :  { %1210 = vmatpush.bf16.msrb.mxu0 %v1819_v28  ;;  %1223 = vmatpush.bf16.msrb.mxu1 %v1832_v32  ;;  %v1514_v28 = vld [vmem:[%s2413_s0 + $0x58] sm:$0xff] }
 0x38b   :  { %1236 = vmatpush.bf16.msrb.mxu2 %v1860_v42  ;;  %1249 = vmatpush.bf16.msrb.mxu3 %v1834_v33  ;;  %v926_v34 = vunpack.c.h.bf16 %v1514_v28 }
 0x38e   :  { %1211 = vmatpush.bf16.msrb.mxu0 %v1858_v41  ;;  %1224 = vmatpush.bf16.msrb.mxu1 %v1870_v45 }
 0x38f   :  { %1237 = vmatpush.bf16.msrb.mxu2 %v1896_v54  ;;  %1250 = vmatpush.bf16.msrb.mxu3 %v1872_v46 }
 0x392   :  { %1212 = vmatpush.bf16.msrb.mxu0 %v1894_v53  ;;  %1225 = vmatpush.bf16.msrb.mxu1 %v1906_v57 }
 0x393   :  { %1238 = vmatpush.bf16.msrb.mxu2 %v1935_v4  ;;  %1251 = vmatpush.bf16.msrb.mxu3 %v1908_v58 }
 0x396   :  { %1213 = vmatpush.bf16.msrb.mxu0 %v1933_v2  ;;  %1226 = vmatpush.bf16.msrb.mxu1 %v1948_v10 }
 0x397   :  { %1239 = vmatpush.bf16.msrb.mxu2 %v1971_v23  ;;  %1252 = vmatpush.bf16.msrb.mxu3 %v1950_v11  ;;  %v1526_v23 = vld [vmem:[%s2411_s1 + $0x30] sm:$0xff] }
 0x398   :  { %1191 = vperm.xlu0 %1570, %v1526_v23  }
 0x39a   :  { %1214 = vmatpush.bf16.msrb.mxu0 %v1969_v22  ;;  %1227 = vmatpush.bf16.msrb.mxu1 %v1981_v26  ;;  %v925_v22 = vunpack.c.l.bf16 %v1514_v28 }
 0x39b   :  { %1240 = vmatpush.bf16.msrb.mxu2 %v2010_v40  ;;  %1253 = vmatpush.bf16.msrb.mxu3 %v1983_v27 }
 0x39e   :  { %1215 = vmatpush.bf16.msrb.mxu0 %v2005_v38  ;;  %1228 = vmatpush.bf16.msrb.mxu1 %v2014_v43 }
 0x39f   :  { %1241 = vmatpush.bf16.msrb.mxu2 %v2028_v50  ;;  %1254 = vmatpush.bf16.msrb.mxu3 %v2016_v44 }
 0x3fd   :  { %v937_v12 = vpop.f32.mrf.mxu0  ;;  %v950_v16 = vpop.f32.mrf.mxu1 }
 0x3fe   :  { %v980_v17 = vadd.f32 %v937_v12, %v923_v7  ;;  %v981_v21 = vadd.f32 %v950_v16, %v924_v8  ;;  %v1521_v16 = vld [vmem:[%s2413_s0 + $0x60] sm:$0xff] }
 0x400   :  { %v1515_v32 = vmul.f32 -1.442695, %v980_v17  ;;  %v1516_v33 = vmul.f32 -1.442695, %v981_v21  ;;  %v1063_v17 = vunpack.c.l.bf16 %v1521_v16  ;;  %v1064_v21 = vunpack.c.h.bf16 %v1521_v16 }
 0x402   :  { %1653 = vpow2.f32 %v1515_v32 }
 0x403   :  { %1655 = vpow2.f32 %v1516_v33 }
 0x404   :  { %v963_v41 = vpop.f32.mrf.mxu2  ;;  %v976_v42 = vpop.f32.mrf.mxu3 }
 0x405   :  { %v983_v45 = vadd.f32 %v976_v42, %v926_v34  ;;  %v939_v46 = vpop.f32.mrf.mxu0  ;;  %v952_v53 = vpop.f32.mrf.mxu1  ;;  %v982_v40 = vadd.f32 %v963_v41, %v925_v22  ;;  %v1522_v41 = vld [vmem:[%s2413_s0 + $0x68] sm:$0xff] }
 0x406   :  { %v1066_v46 = vunpack.c.h.bf16 %v1522_v41 }
 0x407   :  { %v1517_v54 = vmul.f32 -1.442695, %v983_v45 }
 0x408   :  { %v1654_v57 = vpop.eup %1653 }
 0x409   :  { %v1656_v58 = vpop.eup %1655  ;;  %v987_v2 = vadd.f32 1.0, %v1654_v57  ;;  %1657 = vpow2.f32 %v1517_v54 }
 0x40a   :  { %v1006_v4 = vadd.f32 1.0, %v1656_v58 }
 0x40b   :  { %1659 = vrcp.f32 %v987_v2  ;;  %v999_v47 = vand.u32 2147483648, %v987_v2  ;;  %v997_v24 = vand.u32 2147483647, %v987_v2  ;;  %vm993_vm14 = vweird.f32 %v987_v2 }
 0x40c   :  { %1661 = vrcp.f32 %v1006_v4  ;;  %v965_v10 = vpop.f32.mrf.mxu2  ;;  %v978_v11 = vpop.f32.mrf.mxu3  ;;  %v1018_v55 = vand.u32 2147483648, %v1006_v4  ;;  %v1016_v59 = vand.u32 2147483647, %v1006_v4  ;;  %vm1012_vm0 = vweird.f32 %v1006_v4 }
 0x40d   :  { %v1000_v62 = vor.u32 1.1754944e-38, %v999_v47  ;;  %vm998_vm1 = vcmp.eq.f32.partialorder %v997_v24, 8.507059e+37 }
 0x40e   :  { %v1019_v1 = vor.u32 1.1754944e-38, %v1018_v55  ;;  %vm1017_vm3 = vcmp.eq.f32.partialorder %v1016_v59, 8.507059e+37 }
 0x40f   :  { %v1658_v26 = vpop.eup %1657 }
 0x410   :  { %v1026_v27 = vadd.f32 1.0, %v1658_v26 }
 0x411   :  { %v1660_v38 = vpop.eup %1659 }
 0x412   :  { %v1662_v43 = vpop.eup %1661  ;;  %v989_v44 = vmul.f32 %v1660_v38, %v987_v2  ;;  %1663 = vrcp.f32 %v1026_v27  ;;  %vm994_vm12 = vweird.f32 %v1660_v38  ;;  %v1038_v9 = vand.u32 2147483648, %v1026_v27 }
 0x413   :  { %v1008_v50 = vmul.f32 %v1662_v43, %v1006_v4  ;;  %1665 = vtanh.f32 %v982_v40  ;;  %vm1013_vm13 = vweird.f32 %v1662_v43  ;;  %vm995_vm15 = vmor %vm993_vm14, %vm994_vm12  ;;  %vm1032_vm5 = vweird.f32 %v1026_v27  ;;  %v1534_v40 = vld [vmem:[%s2411_s1 + $0x38] sm:$0xff] }
 0x414   :  { %v990_v63 = vsub.f32 1.0, %v989_v44  ;;  %vm1014_vm2 = vmor %vm1012_vm0, %vm1013_vm13  ;;  %v1036_v31 = vand.u32 2147483647, %v1026_v27  ;;  %v1039_v48 = vor.u32 1.1754944e-38, %v1038_v9  ;;  %1331 = vperm.xlu1 %1571, %v1534_v40  }
 0x415   :  { %v1009_v49 = vsub.f32 1.0, %v1008_v50 }
 0x416   :  { %v991_v51 = vmul.f32 %v1660_v38, %v990_v63  ;;  %vm1037_vm7 = vcmp.eq.f32.partialorder %v1036_v31, 8.507059e+37  ;;  %v1192_v31 = vpop.permute.xlu0 %1191 }
 0x417   :  { %v1010_v36 = vmul.f32 %v1662_v43, %v1009_v49 }
 0x418   :  { %v1664_v61 = vpop.eup %1663  ;;  %v992_v60 = vadd.f32 %v1660_v38, %v991_v51 }
 0x419   :  { %v1011_v52 = vadd.f32 %v1662_v43, %v1010_v36  ;;  %v1028_v0 = vmul.f32 %v1664_v61, %v1026_v27  ;;  %v1666_v6 = vpop.eup %1665  ;;  %vm1033_vm4 = vweird.f32 %v1664_v61 }
 0x41a   :  { %v996_v5 = vsel %vm995_vm15, %v1660_v38, %v992_v60  ;;  %vm1034_vm6 = vmor %vm1032_vm5, %vm1033_vm4  ;;  %v1065_v38 = vunpack.c.l.bf16 %v1522_v41 }
 0x41b   :  { %v1001_v37 = vsel %vm998_vm1, %v1000_v62, %v996_v5  ;;  %v1015_v13 = vsel %vm1014_vm2, %v1662_v43, %v1011_v52  ;;  %v1029_v15 = vsub.f32 1.0, %v1028_v0 }
 0x41c   :  { %v1020_v35 = vsel %vm1017_vm3, %v1019_v1, %v1015_v13  ;;  %v1043_v29 = vmul.f32 %v1666_v6, %v1001_v37 }
 0x41d   :  { %v1030_v14 = vmul.f32 %v1664_v61, %v1029_v15  ;;  %v1042_v18 = vmul.f32 %v1020_v35, %v2315_v19 }
 0x41f   :  { %v2367_v25 = vadd.f32 %v1043_v29, %v1042_v18  ;;  %v1031_v20 = vadd.f32 %v1664_v61, %v1030_v14 }
 0x421   :  { %1667 = vtanh.f32 %v2367_v25  ;;  %v1057_v30 = vmul.f32 %v1052_v56, %v2367_v25  ;;  %v1035_v39 = vsel %vm1034_vm6, %v1664_v61, %v1031_v20 }
 0x422   :  { %v1040_v3 = vsel %vm1037_vm7, %v1039_v48, %v1035_v39 }
 0x423   :  { %1520 = vst [vmem:[%s2415_s6 + $0x28] sm:$0xff] %v1057_v30 }
 0x427   :  { %v1668_v19 = vpop.eup %1667 }
 0x428   :  { %v1046_v7 = vmul.f32 %v1668_v19, %v1040_v3 }
 0x42a   :  { %v1054_v8 = vmul.f32 %v1052_v56, %v1046_v7  ;;  %v1067_v12 = vpack.c.bf16 %v1046_v7, %v1046_v7 }
 0x42c   :  { %1519 = vst [vmem:[%s2416_s5 + $0x28] sm:$0xff] %v1054_v8  ;;  %1076 = vmatmul.bf16.vlgmr.msra.gmra.mxu0 %v1067_v12  ;;  %1089 = vmatmul.bf16.vlgmr.msra.gmra.mxu1 %v1067_v12 }
 0x42d   :  { %1102 = vmatmul.bf16.vlgmr.msra.gmra.mxu2 %v1067_v12  ;;  %1115 = vmatmul.bf16.vlgmr.msra.gmra.mxu3 %v1067_v12 }
 0x4a9   :  { %v1077_v28 = vpop.f32.mrf.mxu0  ;;  %v1090_v32 = vpop.f32.mrf.mxu1 }
 0x4aa   :  { %v1120_v33 = vadd.f32 %v1077_v28, %v1063_v17  ;;  %v1121_v34 = vadd.f32 %v1090_v32, %v1064_v21  ;;  %v1529_v32 = vld [vmem:[%s2413_s0 + $0x70] sm:$0xff] }
 0x4ac   :  { %v1523_v42 = vmul.f32 -1.442695, %v1120_v33  ;;  %v1524_v45 = vmul.f32 -1.442695, %v1121_v34  ;;  %v1203_v33 = vunpack.c.l.bf16 %v1529_v32  ;;  %v1204_v34 = vunpack.c.h.bf16 %v1529_v32 }
 0x4ae   :  { %1669 = vpow2.f32 %v1523_v42 }
 0x4af   :  { %1671 = vpow2.f32 %v1524_v45 }
 0x4b0   :  { %v1103_v53 = vpop.f32.mrf.mxu2  ;;  %v1116_v54 = vpop.f32.mrf.mxu3 }
 0x4b1   :  { %v1123_v57 = vadd.f32 %v1116_v54, %v1066_v46  ;;  %v1079_v58 = vpop.f32.mrf.mxu0  ;;  %v1092_v2 = vpop.f32.mrf.mxu1  ;;  %v1122_v63 = vadd.f32 %v1103_v53, %v1065_v38  ;;  %v1530_v53 = vld [vmem:[%s2413_s0 + $0x78] sm:$0xff] }
 0x4b2   :  { %v1206_v58 = vunpack.c.h.bf16 %v1530_v53 }
 0x4b3   :  { %v1525_v4 = vmul.f32 -1.442695, %v1123_v57 }
 0x4b4   :  { %v1670_v10 = vpop.eup %1669 }
 0x4b5   :  { %v1672_v11 = vpop.eup %1671  ;;  %v1127_v22 = vadd.f32 1.0, %v1670_v10  ;;  %1673 = vpow2.f32 %v1525_v4 }
 0x4b6   :  { %v1146_v23 = vadd.f32 1.0, %v1672_v11 }
 0x4b7   :  { %1675 = vrcp.f32 %v1127_v22  ;;  %v1139_v36 = vand.u32 2147483648, %v1127_v22  ;;  %v1137_v61 = vand.u32 2147483647, %v1127_v22  ;;  %vm1133_vm10 = vweird.f32 %v1127_v22 }
 0x4b8   :  { %1677 = vrcp.f32 %v1146_v23  ;;  %v1105_v26 = vpop.f32.mrf.mxu2  ;;  %v1118_v27 = vpop.f32.mrf.mxu3  ;;  %v1158_v60 = vand.u32 2147483648, %v1146_v23  ;;  %v1156_v52 = vand.u32 2147483647, %v1146_v23  ;;  %vm1152_vm12 = vweird.f32 %v1146_v23 }
 0x4b9   :  { %v1140_v1 = vor.u32 1.1754944e-38, %v1139_v36  ;;  %vm1138_vm13 = vcmp.eq.f32.partialorder %v1137_v61, 8.507059e+37 }
 0x4ba   :  { %v1159_v15 = vor.u32 1.1754944e-38, %v1158_v60  ;;  %vm1157_vm15 = vcmp.eq.f32.partialorder %v1156_v52, 8.507059e+37 }
 0x4bb   :  { %v1674_v43 = vpop.eup %1673 }
 0x4bc   :  { %v1166_v44 = vadd.f32 1.0, %v1674_v43 }
 0x4bd   :  { %v1676_v50 = vpop.eup %1675 }
 0x4be   :  { %v1678_v49 = vpop.eup %1677  ;;  %v1129_v47 = vmul.f32 %v1676_v50, %v1127_v22  ;;  %1679 = vrcp.f32 %v1166_v44  ;;  %vm1134_vm8 = vweird.f32 %v1676_v50  ;;  %v1178_v19 = vand.u32 2147483648, %v1166_v44 }
 0x4bf   :  { %v1148_v51 = vmul.f32 %v1678_v49, %v1146_v23  ;;  %1681 = vtanh.f32 %v1122_v63  ;;  %vm1153_vm9 = vweird.f32 %v1678_v49  ;;  %vm1135_vm11 = vmor %vm1133_vm10, %vm1134_vm8  ;;  %vm1172_vm1 = vweird.f32 %v1166_v44 }
 0x4c0   :  { %v1130_v24 = vsub.f32 1.0, %v1129_v47  ;;  %vm1154_vm14 = vmor %vm1152_vm12, %vm1153_vm9  ;;  %v1176_v7 = vand.u32 2147483647, %v1166_v44  ;;  %v1179_v12 = vor.u32 1.1754944e-38, %v1178_v19 }
 0x4c1   :  { %v1149_v55 = vsub.f32 1.0, %v1148_v51 }
 0x4c2   :  { %v1131_v59 = vmul.f32 %v1676_v50, %v1130_v24  ;;  %vm1177_vm3 = vcmp.eq.f32.partialorder %v1176_v7, 8.507059e+37  ;;  %v1332_v7 = vpop.permute.xlu1 %1331 }
 0x4c3   :  { %v1150_v62 = vmul.f32 %v1678_v49, %v1149_v55 }
 0x4c4   :  { %v1680_v0 = vpop.eup %1679  ;;  %v1132_v5 = vadd.f32 %v1676_v50, %v1131_v59 }
 0x4c5   :  { %v1151_v6 = vadd.f32 %v1678_v49, %v1150_v62  ;;  %v1168_v37 = vmul.f32 %v1680_v0, %v1166_v44  ;;  %v1682_v35 = vpop.eup %1681  ;;  %vm1173_vm0 = vweird.f32 %v1680_v0 }
 0x4c6   :  { %v1136_v13 = vsel %vm1135_vm11, %v1676_v50, %v1132_v5  ;;  %vm1174_vm2 = vmor %vm1172_vm1, %vm1173_vm0  ;;  %v1205_v50 = vunpack.c.l.bf16 %v1530_v53 }
 0x4c7   :  { %v1141_v29 = vsel %vm1138_vm13, %v1140_v1, %v1136_v13  ;;  %v1155_v14 = vsel %vm1154_vm14, %v1678_v49, %v1151_v6  ;;  %v1169_v18 = vsub.f32 1.0, %v1168_v37 }
 0x4c8   :  { %v1160_v56 = vsel %vm1157_vm15, %v1159_v15, %v1155_v14  ;;  %v1183_v20 = vmul.f32 %v1682_v35, %v1141_v29 }
 0x4c9   :  { %v1170_v9 = vmul.f32 %v1680_v0, %v1169_v18  ;;  %v1182_v30 = vmul.f32 %v1160_v56, %v2367_v25 }
 0x4cb   :  { %v2387_v39 = vadd.f32 %v1183_v20, %v1182_v30  ;;  %v1171_v48 = vadd.f32 %v1680_v0, %v1170_v9 }
 0x4cd   :  { %1683 = vtanh.f32 %v2387_v39  ;;  %v1197_v3 = vmul.f32 %v1192_v31, %v2387_v39  ;;  %v1175_v8 = vsel %vm1174_vm2, %v1680_v0, %v1171_v48 }
 0x4ce   :  { %v1180_v16 = vsel %vm1177_vm3, %v1179_v12, %v1175_v8 }
 0x4cf   :  { %1528 = vst [vmem:[%s2415_s6 + $0x30] sm:$0xff] %v1197_v3 }
 0x4d3   :  { %v1684_v25 = vpop.eup %1683 }
 0x4d4   :  { %v1186_v17 = vmul.f32 %v1684_v25, %v1180_v16 }
 0x4d6   :  { %v1194_v21 = vmul.f32 %v1192_v31, %v1186_v17  ;;  %v1207_v28 = vpack.c.bf16 %v1186_v17, %v1186_v17 }
 0x4d8   :  { %1527 = vst [vmem:[%s2416_s5 + $0x30] sm:$0xff] %v1194_v21  ;;  %1216 = vmatmul.bf16.vlgmr.msrb.gmra.mxu0 %v1207_v28  ;;  %1229 = vmatmul.bf16.vlgmr.msrb.gmra.mxu1 %v1207_v28 }
 0x4d9   :  { %1242 = vmatmul.bf16.vlgmr.msrb.gmra.mxu2 %v1207_v28  ;;  %1255 = vmatmul.bf16.vlgmr.msrb.gmra.mxu3 %v1207_v28 }
 0x555   :  { %v1217_v41 = vpop.f32.mrf.mxu0  ;;  %v1230_v42 = vpop.f32.mrf.mxu1 }
 0x556   :  { %v1260_v45 = vadd.f32 %v1217_v41, %v1203_v33  ;;  %v1261_v46 = vadd.f32 %v1230_v42, %v1204_v34 }
 0x558   :  { %v1531_v54 = vmul.f32 -1.442695, %v1260_v45  ;;  %v1532_v57 = vmul.f32 -1.442695, %v1261_v46 }
 0x55a   :  { %1685 = vpow2.f32 %v1531_v54 }
 0x55b   :  { %1687 = vpow2.f32 %v1532_v57 }
 0x55c   :  { %v1243_v2 = vpop.f32.mrf.mxu2  ;;  %v1256_v4 = vpop.f32.mrf.mxu3 }
 0x55d   :  { %v1263_v10 = vadd.f32 %v1256_v4, %v1206_v58  ;;  %v1219_v11 = vpop.f32.mrf.mxu0  ;;  %v1232_v22 = vpop.f32.mrf.mxu1  ;;  %v1262_v51 = vadd.f32 %v1243_v2, %v1205_v50 }
 0x55f   :  { %v1533_v23 = vmul.f32 -1.442695, %v1263_v10 }
 0x560   :  { %v1686_v26 = vpop.eup %1685 }
 0x561   :  { %v1688_v27 = vpop.eup %1687  ;;  %v1267_v38 = vadd.f32 1.0, %v1686_v26  ;;  %1689 = vpow2.f32 %v1533_v23 }
 0x562   :  { %v1286_v40 = vadd.f32 1.0, %v1688_v27 }
 0x563   :  { %1691 = vrcp.f32 %v1267_v38  ;;  %v1279_v61 = vand.u32 2147483648, %v1267_v38  ;;  %v1277_v52 = vand.u32 2147483647, %v1267_v38  ;;  %vm1273_vm6 = vweird.f32 %v1267_v38 }
 0x564   :  { %1693 = vrcp.f32 %v1286_v40  ;;  %v1245_v43 = vpop.f32.mrf.mxu2  ;;  %v1258_v44 = vpop.f32.mrf.mxu3  ;;  %v1298_v0 = vand.u32 2147483648, %v1286_v40  ;;  %v1296_v1 = vand.u32 2147483647, %v1286_v40  ;;  %vm1292_vm8 = vweird.f32 %v1286_v40 }
 0x565   :  { %v1280_v13 = vor.u32 1.1754944e-38, %v1279_v61  ;;  %vm1278_vm9 = vcmp.eq.f32.partialorder %v1277_v52, 8.507059e+37 }
 0x566   :  { %v1299_v14 = vor.u32 1.1754944e-38, %v1298_v0  ;;  %vm1297_vm11 = vcmp.eq.f32.partialorder %v1296_v1, 8.507059e+37 }
 0x567   :  { %v1690_v63 = vpop.eup %1689 }
 0x568   :  { %v1306_v49 = vadd.f32 1.0, %v1690_v63 }
 0x569   :  { %v1692_v47 = vpop.eup %1691 }
 0x56a   :  { %v1694_v24 = vpop.eup %1693  ;;  %v1269_v55 = vmul.f32 %v1692_v47, %v1267_v38  ;;  %1695 = vrcp.f32 %v1306_v49  ;;  %vm1274_vm4 = vweird.f32 %v1692_v47  ;;  %v1318_v12 = vand.u32 2147483648, %v1306_v49 }
 0x56b   :  { %v1288_v36 = vmul.f32 %v1694_v24, %v1286_v40  ;;  %1697 = vtanh.f32 %v1262_v51  ;;  %vm1293_vm5 = vweird.f32 %v1694_v24  ;;  %vm1275_vm7 = vmor %vm1273_vm6, %vm1274_vm4  ;;  %vm1312_vm13 = vweird.f32 %v1306_v49 }
 0x56c   :  { %v1270_v59 = vsub.f32 1.0, %v1269_v55  ;;  %vm1294_vm10 = vmor %vm1292_vm8, %vm1293_vm5  ;;  %v1316_v16 = vand.u32 2147483647, %v1306_v49  ;;  %v1319_v21 = vor.u32 1.1754944e-38, %v1318_v12 }
 0x56d   :  { %v1289_v60 = vsub.f32 1.0, %v1288_v36 }
 0x56e   :  { %v1271_v62 = vmul.f32 %v1692_v47, %v1270_v59  ;;  %vm1317_vm15 = vcmp.eq.f32.partialorder %v1316_v16, 8.507059e+37 }
 0x56f   :  { %v1290_v5 = vmul.f32 %v1694_v24, %v1289_v60 }
 0x570   :  { %v1696_v6 = vpop.eup %1695  ;;  %v1272_v37 = vadd.f32 %v1692_v47, %v1271_v62 }
 0x571   :  { %v1291_v15 = vadd.f32 %v1694_v24, %v1290_v5  ;;  %v1308_v35 = vmul.f32 %v1696_v6, %v1306_v49  ;;  %v1698_v18 = vpop.eup %1697  ;;  %vm1313_vm12 = vweird.f32 %v1696_v6 }
 0x572   :  { %v1276_v29 = vsel %vm1275_vm7, %v1692_v47, %v1272_v37  ;;  %vm1314_vm14 = vmor %vm1312_vm13, %vm1313_vm12 }
 0x573   :  { %v1281_v56 = vsel %vm1278_vm9, %v1280_v13, %v1276_v29  ;;  %v1295_v20 = vsel %vm1294_vm10, %v1694_v24, %v1291_v15  ;;  %v1309_v9 = vsub.f32 1.0, %v1308_v35 }
 0x574   :  { %v1300_v30 = vsel %vm1297_vm11, %v1299_v14, %v1295_v20  ;;  %v1323_v31 = vmul.f32 %v1698_v18, %v1281_v56 }
 0x575   :  { %v1310_v48 = vmul.f32 %v1696_v6, %v1309_v9  ;;  %v1322_v19 = vmul.f32 %v1300_v30, %v2387_v39 }
 0x577   :  { %v1324_v3 = vadd.f32 %v1323_v31, %v1322_v19  ;;  %v1311_v8 = vadd.f32 %v1696_v6, %v1310_v48 }
 0x579   :  { %1699 = vtanh.f32 %v1324_v3  ;;  %v1337_v25 = vmul.f32 %v1332_v7, %v1324_v3  ;;  %v1315_v17 = vsel %vm1314_vm14, %v1696_v6, %v1311_v8 }
 0x57a   :  { %v1320_v32 = vsel %vm1317_vm15, %v1319_v21, %v1315_v17 }
 0x57b   :  { %1536 = vst [vmem:[%s2415_s6 + $0x38] sm:$0xff] %v1337_v25 }
 0x57f   :  { %v1700_v28 = vpop.eup %1699 }
 0x580   :  { %v1326_v39 = vmul.f32 %v1700_v28, %v1320_v32 }
 0x582   :  { %v1334_v33 = vmul.f32 %v1332_v7, %v1326_v39 }
 0x584   :  { %1535 = vst [vmem:[%s2416_s5 + $0x38] sm:$0xff] %v1334_v33 }

</bundles_post_ra>
